<compile_context>
chip_gen: v7x
topology: tpu7x:2x2x1
jax: 0.10.0
libtpu: 0.0.40
codegen_flags: <defaults>
</compile_context>

<pallas_src>
import functools

import jax
import jax.numpy as jnp
from jax.experimental import pallas as pl
from jax.experimental.pallas import tpu as pltpu

EMBED_SIZE = 32   # embed_size (E)
REPR_SIZE = 16    # repr_size  (H, LSTM hidden per direction)
MARGIN = 0.05
SUBLANE = 8       # f32 sublane tile
LANE = 128        # lane width (also happens to equal 8*H here)

_VMEM = pl.BlockSpec(memory_space=pltpu.MemorySpace.VMEM)


def _round_up(n, m):
    return ((n + m - 1) // m) * m


def _gate_alpha(hidden):
    """Per-lane post-tanh scale for the gate-grouped [i|f|g|o] layout.

    0.5 for the sigmoid gates (i, f, o), 1.0 for the tanh gate (g).  The same vector
    is used at init time to pre-scale the i/f/o weight columns (sigmoid(x) =
    0.5*tanh(0.5*x)+0.5), and inside the kernel as the post-tanh affine scale.
    """
    H2 = 2 * hidden
    return jnp.concatenate([
        jnp.full((H2,), 0.5, jnp.float32),   # i (fwd|bwd)
        jnp.full((H2,), 0.5, jnp.float32),   # f
        jnp.ones((H2,), jnp.float32),        # g
        jnp.full((H2,), 0.5, jnp.float32),   # o
    ])[None, :]                              # [1, 8H]


# ---------------------------------------------------------------------------
# Fused bidirectional LSTM + time max-pool + tanh (fully unrolled, value-based)
# ---------------------------------------------------------------------------
def _bilstm_pool(x2f, wih, whh, b, alpha, beta, seq_len):
    """
    x2f   : [T*SUB, 2E] value; rows t*SUB..t*SUB+SUB hold [x_t | x_{T-1-t}] per row
    wih   : [2E, 8H] block-diagonal, gate-grouped, i/f/o columns pre-scaled by 0.5
    whh   : [2H, 8H] likewise
    b     : [1, 8H]  combined b_ih+b_hh, likewise pre-scaled
    alpha : [1, 8H]  post-tanh scale;  beta = 1 - alpha
    returns [SUB, 2H] = tanh(max_t [h_fwd(t) | h_bwd(t)])
    """
    T = seq_len
    H2 = whh.shape[0]                 # 2H (both directions, lane-concatenated)
    SUB = x2f.shape[0] // T

    # Hoisted input projection: one MXU matmul covering every step & both directions.
    gx = jnp.dot(x2f, wih, preferred_element_type=jnp.float32) + b     # [T*SUB, 8H]

    h = jnp.zeros((SUB, H2), jnp.float32)
    c = jnp.zeros((SUB, H2), jnp.float32)
    m = jnp.full((SUB, H2), -1e30, jnp.float32)   # safe: every encoder has T >= 1

    for t in range(T):   # fully unrolled: static, vreg-aligned slices of gx
        gates = (jnp.dot(h, whh, preferred_element_type=jnp.float32)
                 + gx[t * SUB:(t + 1) * SUB, :])                       # [SUB, 8H]
        act = jnp.tanh(gates) * alpha + beta       # ONE EUP tanh for all 4 gates
        i_ = act[:, 0 * H2:1 * H2]
        f_ = act[:, 1 * H2:2 * H2]
        g_ = act[:, 2 * H2:3 * H2]
        o_ = act[:, 3 * H2:4 * H2]
        c = f_ * c + i_ * g_
        h = o_ * jnp.tanh(c)                        # second (and last) EUP op
        m = jnp.maximum(m, h)
    return jnp.tanh(m)                              # [SUB, 2H]


# ---------------------------------------------------------------------------
# The single fused kernel: 3 encoders + BOW + fuse + cosine + margin loss
# ---------------------------------------------------------------------------
def joint_kernel(nx_ref, ax_ref, dx_ref,
                 nwih_ref, nwhh_ref, nb_ref,
                 awih_ref, awhh_ref, ab_ref,
                 dwih_ref, dwhh_ref, db_ref,
                 alpha_ref, tok_ref, fw_ref, fb_ref,
                 out_ref, *, t_name, t_apis, t_desc, batch):
    alpha = alpha_ref[...]
    beta = 1.0 - alpha

    name_r = _bilstm_pool(nx_ref[...], nwih_ref[...], nwhh_ref[...], nb_ref[...],
                          alpha, beta, t_name)                    # [SUB, 2H]
    apis_r = _bilstm_pool(ax_ref[...], awih_ref[...], awhh_ref[...], ab_ref[...],
                          alpha, beta, t_apis)                    # [SUB, 2H]
    desc_r = _bilstm_pool(dx_ref[...], dwih_ref[...], dwhh_ref[...], db_ref[...],
                          alpha, beta, t_desc)                    # [SUB2, 2H]: good|bad|pad

    # BOW token encoder: max over tokens + tanh.
    tok_r = jnp.tanh(jnp.max(tok_ref[...], axis=0))               # [SUB, E]

    # fuse Linear via row-split weight (no lane concat); cat order name|apis|tokens.
    H2 = 2 * REPR_SIZE
    E = EMBED_SIZE
    fw = fw_ref[...]
    code = jnp.tanh(
        jnp.dot(name_r, fw[0:H2, :], preferred_element_type=jnp.float32)
        + jnp.dot(apis_r, fw[H2:2 * H2, :], preferred_element_type=jnp.float32)
        + jnp.dot(tok_r, fw[2 * H2:2 * H2 + E, :], preferred_element_type=jnp.float32)
        + fb_ref[...])                                            # [SUB, 2H]

    # Cosine similarities (rsqrt -> EUP) + margin ranking loss on the real rows.
    B = batch
    codeB = code[:B]
    good = desc_r[:B]
    bad = desc_r[B:2 * B]
    eps2 = 1e-16        # (cosine eps 1e-8)^2; torch clamps each norm separately
    cn2 = jnp.sum(codeB * codeB, axis=1, keepdims=True)
    gn2 = jnp.sum(good * good, axis=1, keepdims=True)
    bn2 = jnp.sum(bad * bad, axis=1, keepdims=True)
    good_sim = (jnp.sum(codeB * good, axis=1, keepdims=True)
                * jax.lax.rsqrt(jnp.maximum(cn2 * gn2, eps2)))
    bad_sim = (jnp.sum(codeB * bad, axis=1, keepdims=True)
               * jax.lax.rsqrt(jnp.maximum(cn2 * bn2, eps2)))
    loss = jnp.maximum(MARGIN - good_sim + bad_sim, 1e-6)         # [B, 1]

    # Lane-dense output slab: loss broadcast across all 128 lanes; glue reads col 0.
    out_ref[...] = jnp.broadcast_to(loss, out_ref.shape)


# ---------------------------------------------------------------------------
# Plain-JAX glue (embedding gathers, time-major transpose, sublane padding)
# ---------------------------------------------------------------------------
def _embed_bidir_flat(ids, embedding, sub):
    """ids [R, T] -> ([T*sub, 2E] with row t*sub+r = [x_t,r | x_{T-1-t},r], T)."""
    rows, T = ids.shape
    ids_p = jnp.pad(ids, ((0, sub - rows), (0, 0)))                 # pad rows: token 0
    emb = jnp.take(embedding, ids_p, axis=0).astype(jnp.float32)    # [sub, T, E]
    x = jnp.transpose(emb, (1, 0, 2))                               # [T, sub, E]
    x2 = jnp.concatenate([x, x[::-1]], axis=-1)                     # [T, sub, 2E]
    return x2.reshape(T * sub, 2 * EMBED_SIZE), T


def joint_embedder_forward(params, name, apis, tokens, desc_good, desc_bad):
    B = name.shape[0]
    sub = _round_up(B, SUBLANE)
    sub2 = _round_up(2 * B, SUBLANE)

    pn, pa, pt, pd, pf = (params["name"], params["apis"], params["tokens"],
                          params["desc"], params["fuse"])

    name_x2f, Tn = _embed_bidir_flat(name, pn["embedding"], sub)
    apis_x2f, Ta = _embed_bidir_flat(apis, pa["embedding"], sub)
    # desc_good / desc_bad share the desc encoder: stack along batch, encode once.
    desc_ids = jnp.concatenate([desc_good, desc_bad], axis=0)       # [2B, T]
    desc_x2f, Td = _embed_bidir_flat(desc_ids, pd["embedding"], sub2)

    tok_p = jnp.pad(tokens, ((0, sub - B), (0, 0)))
    tok_emb = jnp.transpose(
        jnp.take(pt["embedding"], tok_p, axis=0).astype(jnp.float32), (1, 0, 2))
    # [T_tok, sub, E]

    alpha = _gate_alpha(REPR_SIZE)                                  # [1, 8H]

    out = pl.pallas_call(
        functools.partial(joint_kernel, t_name=Tn, t_apis=Ta, t_desc=Td, batch=B),
        out_shape=jax.ShapeDtypeStruct((B, LANE), jnp.float32),
        in_specs=[_VMEM] * 16,
        out_specs=_VMEM,
    )(name_x2f, apis_x2f, desc_x2f,
      pn["wih_bd"], pn["whh_bd"], pn["b_bd"],
      pa["wih_bd"], pa["whh_bd"], pa["b_bd"],
      pd["wih_bd"], pd["whh_bd"], pd["b_bd"],
      alpha, tok_emb, pf["w"], pf["b"])
    return out[:, 0]                                                # [B], like torch


# ---------------------------------------------------------------------------
# Deterministic parameter initialization + packing (synthetic, no checkpoint)
# ---------------------------------------------------------------------------
def _pack_bidir_gates(wf, wb):
    """Block-diagonal, gate-grouped packing of per-direction gate weights.

    wf: [Df, 4H], wb: [Db, 4H], columns in torch gate order i|f|g|o.
    Returns [Df+Db, 8H]; columns grouped [i_f i_b | f_f f_b | g_f g_b | o_f o_b];
    rows 0:Df feed the forward direction, rows Df: feed the backward direction.
    """
    Df, G4 = wf.shape
    Db = wb.shape[0]
    H = G4 // 4
    out = jnp.zeros((Df + Db, 8 * H), jnp.float32)
    for g in range(4):
        out = out.at[:Df, (2 * g) * H:(2 * g + 1) * H].set(wf[:, g * H:(g + 1) * H])
        out = out.at[Df:, (2 * g + 1) * H:(2 * g + 2) * H].set(wb[:, g * H:(g + 1) * H])
    return out


def _pack_bidir_bias(bf, bb):
    """bf, bb: [4H] combined (b_ih+b_hh), gate order i|f|g|o -> [1, 8H] gate-grouped."""
    H = bf.shape[0] // 4
    parts = []
    for g in range(4):
        parts.append(bf[g * H:(g + 1) * H])
        parts.append(bb[g * H:(g + 1) * H])
    return jnp.concatenate(parts)[None, :]


def init_seq_encoder(key, vocab_size, embed_size, hidden_size):
    """Torch-layout biLSTM weights -> block-diag gate-grouped layout, with the 0.5
    sigmoid pre-scale folded into the i/f/o gate columns (see _gate_alpha)."""
    ks = jax.random.split(key, 9)
    s = 0.1
    H = hidden_size
    emb = jax.random.normal(ks[0], (vocab_size, embed_size), jnp.float32) * s
    w_ih_f = jax.random.normal(ks[1], (4 * H, embed_size), jnp.float32) * s
    w_hh_f = jax.random.normal(ks[2], (4 * H, H), jnp.float32) * s
    b_ih_f = jax.random.normal(ks[3], (4 * H,), jnp.float32) * s
    b_hh_f = jax.random.normal(ks[4], (4 * H,), jnp.float32) * s
    w_ih_b = jax.random.normal(ks[5], (4 * H, embed_size), jnp.float32) * s
    w_hh_b = jax.random.normal(ks[6], (4 * H, H), jnp.float32) * s
    b_ih_b = jax.random.normal(ks[7], (4 * H,), jnp.float32) * s
    b_hh_b = jax.random.normal(ks[8], (4 * H,), jnp.float32) * s
    alpha = _gate_alpha(H)                                           # [1, 8H]
    return {
        "embedding": emb,
        "wih_bd": _pack_bidir_gates(w_ih_f.T, w_ih_b.T) * alpha,            # [2E, 8H]
        "whh_bd": _pack_bidir_gates(w_hh_f.T, w_hh_b.T) * alpha,            # [2H, 8H]
        "b_bd": _pack_bidir_bias(b_ih_f + b_hh_f, b_ih_b + b_hh_b) * alpha, # [1, 8H]
    }


def init_bow_encoder(key, vocab_size, embed_size):
    return {"embedding": jax.random.normal(key, (vocab_size, embed_size), jnp.float32) * 0.1}


def init_fuse(key, embed_size, repr_size):
    kw, kb = jax.random.split(key)
    in_dim = embed_size + 4 * repr_size        # torch cat order: name | apis | tokens
    out_dim = 2 * repr_size
    W = jax.random.normal(kw, (out_dim, in_dim), jnp.float32) * 0.1   # torch [out, in]
    b = jax.random.normal(kb, (1, out_dim), jnp.float32) * 0.1
    return {"w": jnp.transpose(W), "b": b}     # [in_dim, out_dim], [1, out_dim]


def init_params(key):
    k0, k1, k2, k3, k4 = jax.random.split(key, 5)
    return {
        "name": init_seq_encoder(k0, 50, EMBED_SIZE, REPR_SIZE),
        "apis": init_seq_encoder(k1, 60, EMBED_SIZE, REPR_SIZE),
        "tokens": init_bow_encoder(k2, 70, EMBED_SIZE),
        "desc": init_seq_encoder(k3, 80, EMBED_SIZE, REPR_SIZE),
        "fuse": init_fuse(k4, EMBED_SIZE, REPR_SIZE),
    }


if __name__ == "__main__":
    key = jax.random.PRNGKey(0)
    kp, k_name, k_apis, k_tok, k_dg, k_db = jax.random.split(key, 6)

    params = init_params(kp)

    B = 2
    name = jax.random.randint(k_name, (B, 6), 0, 50, dtype=jnp.int32)
    apis = jax.random.randint(k_apis, (B, 8), 0, 60, dtype=jnp.int32)
    tokens = jax.random.randint(k_tok, (B, 10), 0, 70, dtype=jnp.int32)
    desc_good = jax.random.randint(k_dg, (B, 8), 0, 80, dtype=jnp.int32)
    desc_bad = jax.random.randint(k_db, (B, 8), 0, 80, dtype=jnp.int32)

    fwd = jax.jit(joint_embedder_forward)
    loss = fwd(params, name, apis, tokens, desc_good, desc_bad)
    jax.block_until_ready(loss)

    assert loss.shape == (B,)
    assert bool(jnp.all(loss >= 1e-6)) and bool(jnp.all(jnp.isfinite(loss)))
    print("KERNEL_OK")
</pallas_src>

<mosaic_0001>
module attributes {stable_mosaic.version = 11 : i64} {
  func.func @joint_kernel(%arg0: memref<48x64xf32, #tpu.memory_space<vmem>>, %arg1: memref<64x64xf32, #tpu.memory_space<vmem>>, %arg2: memref<64x64xf32, #tpu.memory_space<vmem>>, %arg3: memref<64x128xf32, #tpu.memory_space<vmem>>, %arg4: memref<32x128xf32, #tpu.memory_space<vmem>>, %arg5: memref<1x128xf32, #tpu.memory_space<vmem>>, %arg6: memref<64x128xf32, #tpu.memory_space<vmem>>, %arg7: memref<32x128xf32, #tpu.memory_space<vmem>>, %arg8: memref<1x128xf32, #tpu.memory_space<vmem>>, %arg9: memref<64x128xf32, #tpu.memory_space<vmem>>, %arg10: memref<32x128xf32, #tpu.memory_space<vmem>>, %arg11: memref<1x128xf32, #tpu.memory_space<vmem>>, %arg12: memref<1x128xf32, #tpu.memory_space<vmem>>, %arg13: memref<10x8x32xf32, #tpu.memory_space<vmem>>, %arg14: memref<96x32xf32, #tpu.memory_space<vmem>>, %arg15: memref<1x32xf32, #tpu.memory_space<vmem>>, %arg16: memref<2x128xf32, #tpu.memory_space<vmem>>) attributes {dimension_semantics = [], scalar_prefetch = 0 : i64, scratch_operands = 0 : i64, tpu.core_type = #tpu.core_type<tc>} {
    %c0 = arith.constant 0 : index
    %c0_0 = arith.constant 0 : index
    %0 = vector.load %arg12[%c0, %c0_0] : memref<1x128xf32, #tpu.memory_space<vmem>>, vector<1x128xf32>
    %cst = arith.constant 1.000000e+00 : f32
    %1 = vector.broadcast %cst : f32 to vector<1x128xf32>
    %2 = arith.subf %1, %0 : vector<1x128xf32>
    %c0_1 = arith.constant 0 : index
    %c0_2 = arith.constant 0 : index
    %3 = vector.load %arg0[%c0_1, %c0_2] : memref<48x64xf32, #tpu.memory_space<vmem>>, vector<48x64xf32>
    %c0_3 = arith.constant 0 : index
    %c0_4 = arith.constant 0 : index
    %4 = vector.load %arg3[%c0_3, %c0_4] : memref<64x128xf32, #tpu.memory_space<vmem>>, vector<64x128xf32>
    %c0_5 = arith.constant 0 : index
    %c0_6 = arith.constant 0 : index
    %5 = vector.load %arg4[%c0_5, %c0_6] : memref<32x128xf32, #tpu.memory_space<vmem>>, vector<32x128xf32>
    %c0_7 = arith.constant 0 : index
    %c0_8 = arith.constant 0 : index
    %6 = vector.load %arg5[%c0_7, %c0_8] : memref<1x128xf32, #tpu.memory_space<vmem>>, vector<1x128xf32>
    %cst_9 = arith.constant dense<0.000000e+00> : vector<48x128xf32>
    %7 = tpu.matmul %3, %4, %cst_9 {dimension_numbers = #tpu.dot_dimension_numbers<[1], [0], [0], [1], [0, 0, 1, 1], [], []>} : vector<48x64xf32>, vector<64x128xf32>, vector<48x128xf32> -> vector<48x128xf32>
    %8 = vector.broadcast %6 : vector<1x128xf32> to vector<48x128xf32>
    %9 = arith.addf %7, %8 : vector<48x128xf32>
    %cst_10 = arith.constant 0.000000e+00 : f32
    %10 = vector.broadcast %cst_10 : f32 to vector<8x32xf32>
    %cst_11 = arith.constant 0.000000e+00 : f32
    %11 = vector.broadcast %cst_11 : f32 to vector<8x32xf32>
    %cst_12 = arith.constant -1.000000e+30 : f32
    %12 = vector.broadcast %cst_12 : f32 to vector<8x32xf32>
    %cst_13 = arith.constant dense<0.000000e+00> : vector<8x128xf32>
    %13 = tpu.matmul %10, %5, %cst_13 {dimension_numbers = #tpu.dot_dimension_numbers<[1], [0], [0], [1], [0, 0, 1, 1], [], []>} : vector<8x32xf32>, vector<32x128xf32>, vector<8x128xf32> -> vector<8x128xf32>
    %14 = vector.extract_strided_slice %9 {offsets = [0, 0], sizes = [8, 128], strides = [1, 1]} : vector<48x128xf32> to vector<8x128xf32>
    %15 = arith.addf %13, %14 : vector<8x128xf32>
    %16 = math.tanh %15 : vector<8x128xf32>
    %17 = vector.broadcast %0 : vector<1x128xf32> to vector<8x128xf32>
    %18 = arith.mulf %16, %17 : vector<8x128xf32>
    %19 = vector.broadcast %2 : vector<1x128xf32> to vector<8x128xf32>
    %20 = arith.addf %18, %19 : vector<8x128xf32>
    %21 = vector.extract_strided_slice %20 {offsets = [0, 0], sizes = [8, 32], strides = [1, 1]} : vector<8x128xf32> to vector<8x32xf32>
    %22 = vector.extract_strided_slice %20 {offsets = [0, 32], sizes = [8, 32], strides = [1, 1]} : vector<8x128xf32> to vector<8x32xf32>
    %23 = vector.extract_strided_slice %20 {offsets = [0, 64], sizes = [8, 32], strides = [1, 1]} : vector<8x128xf32> to vector<8x32xf32>
    %24 = vector.extract_strided_slice %20 {offsets = [0, 96], sizes = [8, 32], strides = [1, 1]} : vector<8x128xf32> to vector<8x32xf32>
    %25 = arith.mulf %22, %11 : vector<8x32xf32>
    %26 = arith.mulf %21, %23 : vector<8x32xf32>
    %27 = arith.addf %25, %26 : vector<8x32xf32>
    %28 = math.tanh %27 : vector<8x32xf32>
    %29 = arith.mulf %24, %28 : vector<8x32xf32>
    %30 = arith.maximumf %12, %29 : vector<8x32xf32>
    %cst_14 = arith.constant dense<0.000000e+00> : vector<8x128xf32>
    %31 = tpu.matmul %29, %5, %cst_14 {dimension_numbers = #tpu.dot_dimension_numbers<[1], [0], [0], [1], [0, 0, 1, 1], [], []>} : vector<8x32xf32>, vector<32x128xf32>, vector<8x128xf32> -> vector<8x128xf32>
    %32 = vector.extract_strided_slice %9 {offsets = [8, 0], sizes = [8, 128], strides = [1, 1]} : vector<48x128xf32> to vector<8x128xf32>
    %33 = arith.addf %31, %32 : vector<8x128xf32>
    %34 = math.tanh %33 : vector<8x128xf32>
    %35 = vector.broadcast %0 : vector<1x128xf32> to vector<8x128xf32>
    %36 = arith.mulf %34, %35 : vector<8x128xf32>
    %37 = vector.broadcast %2 : vector<1x128xf32> to vector<8x128xf32>
    %38 = arith.addf %36, %37 : vector<8x128xf32>
    %39 = vector.extract_strided_slice %38 {offsets = [0, 0], sizes = [8, 32], strides = [1, 1]} : vector<8x128xf32> to vector<8x32xf32>
    %40 = vector.extract_strided_slice %38 {offsets = [0, 32], sizes = [8, 32], strides = [1, 1]} : vector<8x128xf32> to vector<8x32xf32>
    %41 = vector.extract_strided_slice %38 {offsets = [0, 64], sizes = [8, 32], strides = [1, 1]} : vector<8x128xf32> to vector<8x32xf32>
    %42 = vector.extract_strided_slice %38 {offsets = [0, 96], sizes = [8, 32], strides = [1, 1]} : vector<8x128xf32> to vector<8x32xf32>
    %43 = arith.mulf %40, %27 : vector<8x32xf32>
    %44 = arith.mulf %39, %41 : vector<8x32xf32>
    %45 = arith.addf %43, %44 : vector<8x32xf32>
    %46 = math.tanh %45 : vector<8x32xf32>
    %47 = arith.mulf %42, %46 : vector<8x32xf32>
    %48 = arith.maximumf %30, %47 : vector<8x32xf32>
    %cst_15 = arith.constant dense<0.000000e+00> : vector<8x128xf32>
    %49 = tpu.matmul %47, %5, %cst_15 {dimension_numbers = #tpu.dot_dimension_numbers<[1], [0], [0], [1], [0, 0, 1, 1], [], []>} : vector<8x32xf32>, vector<32x128xf32>, vector<8x128xf32> -> vector<8x128xf32>
    %50 = vector.extract_strided_slice %9 {offsets = [16, 0], sizes = [8, 128], strides = [1, 1]} : vector<48x128xf32> to vector<8x128xf32>
    %51 = arith.addf %49, %50 : vector<8x128xf32>
    %52 = math.tanh %51 : vector<8x128xf32>
    %53 = vector.broadcast %0 : vector<1x128xf32> to vector<8x128xf32>
    %54 = arith.mulf %52, %53 : vector<8x128xf32>
    %55 = vector.broadcast %2 : vector<1x128xf32> to vector<8x128xf32>
    %56 = arith.addf %54, %55 : vector<8x128xf32>
    %57 = vector.extract_strided_slice %56 {offsets = [0, 0], sizes = [8, 32], strides = [1, 1]} : vector<8x128xf32> to vector<8x32xf32>
    %58 = vector.extract_strided_slice %56 {offsets = [0, 32], sizes = [8, 32], strides = [1, 1]} : vector<8x128xf32> to vector<8x32xf32>
    %59 = vector.extract_strided_slice %56 {offsets = [0, 64], sizes = [8, 32], strides = [1, 1]} : vector<8x128xf32> to vector<8x32xf32>
    %60 = vector.extract_strided_slice %56 {offsets = [0, 96], sizes = [8, 32], strides = [1, 1]} : vector<8x128xf32> to vector<8x32xf32>
    %61 = arith.mulf %58, %45 : vector<8x32xf32>
    %62 = arith.mulf %57, %59 : vector<8x32xf32>
    %63 = arith.addf %61, %62 : vector<8x32xf32>
    %64 = math.tanh %63 : vector<8x32xf32>
    %65 = arith.mulf %60, %64 : vector<8x32xf32>
    %66 = arith.maximumf %48, %65 : vector<8x32xf32>
    %cst_16 = arith.constant dense<0.000000e+00> : vector<8x128xf32>
    %67 = tpu.matmul %65, %5, %cst_16 {dimension_numbers = #tpu.dot_dimension_numbers<[1], [0], [0], [1], [0, 0, 1, 1], [], []>} : vector<8x32xf32>, vector<32x128xf32>, vector<8x128xf32> -> vector<8x128xf32>
    %68 = vector.extract_strided_slice %9 {offsets = [24, 0], sizes = [8, 128], strides = [1, 1]} : vector<48x128xf32> to vector<8x128xf32>
    %69 = arith.addf %67, %68 : vector<8x128xf32>
    %70 = math.tanh %69 : vector<8x128xf32>
    %71 = vector.broadcast %0 : vector<1x128xf32> to vector<8x128xf32>
    %72 = arith.mulf %70, %71 : vector<8x128xf32>
    %73 = vector.broadcast %2 : vector<1x128xf32> to vector<8x128xf32>
    %74 = arith.addf %72, %73 : vector<8x128xf32>
    %75 = vector.extract_strided_slice %74 {offsets = [0, 0], sizes = [8, 32], strides = [1, 1]} : vector<8x128xf32> to vector<8x32xf32>
    %76 = vector.extract_strided_slice %74 {offsets = [0, 32], sizes = [8, 32], strides = [1, 1]} : vector<8x128xf32> to vector<8x32xf32>
    %77 = vector.extract_strided_slice %74 {offsets = [0, 64], sizes = [8, 32], strides = [1, 1]} : vector<8x128xf32> to vector<8x32xf32>
    %78 = vector.extract_strided_slice %74 {offsets = [0, 96], sizes = [8, 32], strides = [1, 1]} : vector<8x128xf32> to vector<8x32xf32>
    %79 = arith.mulf %76, %63 : vector<8x32xf32>
    %80 = arith.mulf %75, %77 : vector<8x32xf32>
    %81 = arith.addf %79, %80 : vector<8x32xf32>
    %82 = math.tanh %81 : vector<8x32xf32>
    %83 = arith.mulf %78, %82 : vector<8x32xf32>
    %84 = arith.maximumf %66, %83 : vector<8x32xf32>
    %cst_17 = arith.constant dense<0.000000e+00> : vector<8x128xf32>
    %85 = tpu.matmul %83, %5, %cst_17 {dimension_numbers = #tpu.dot_dimension_numbers<[1], [0], [0], [1], [0, 0, 1, 1], [], []>} : vector<8x32xf32>, vector<32x128xf32>, vector<8x128xf32> -> vector<8x128xf32>
    %86 = vector.extract_strided_slice %9 {offsets = [32, 0], sizes = [8, 128], strides = [1, 1]} : vector<48x128xf32> to vector<8x128xf32>
    %87 = arith.addf %85, %86 : vector<8x128xf32>
    %88 = math.tanh %87 : vector<8x128xf32>
    %89 = vector.broadcast %0 : vector<1x128xf32> to vector<8x128xf32>
    %90 = arith.mulf %88, %89 : vector<8x128xf32>
    %91 = vector.broadcast %2 : vector<1x128xf32> to vector<8x128xf32>
    %92 = arith.addf %90, %91 : vector<8x128xf32>
    %93 = vector.extract_strided_slice %92 {offsets = [0, 0], sizes = [8, 32], strides = [1, 1]} : vector<8x128xf32> to vector<8x32xf32>
    %94 = vector.extract_strided_slice %92 {offsets = [0, 32], sizes = [8, 32], strides = [1, 1]} : vector<8x128xf32> to vector<8x32xf32>
    %95 = vector.extract_strided_slice %92 {offsets = [0, 64], sizes = [8, 32], strides = [1, 1]} : vector<8x128xf32> to vector<8x32xf32>
    %96 = vector.extract_strided_slice %92 {offsets = [0, 96], sizes = [8, 32], strides = [1, 1]} : vector<8x128xf32> to vector<8x32xf32>
    %97 = arith.mulf %94, %81 : vector<8x32xf32>
    %98 = arith.mulf %93, %95 : vector<8x32xf32>
    %99 = arith.addf %97, %98 : vector<8x32xf32>
    %100 = math.tanh %99 : vector<8x32xf32>
    %101 = arith.mulf %96, %100 : vector<8x32xf32>
    %102 = arith.maximumf %84, %101 : vector<8x32xf32>
    %cst_18 = arith.constant dense<0.000000e+00> : vector<8x128xf32>
    %103 = tpu.matmul %101, %5, %cst_18 {dimension_numbers = #tpu.dot_dimension_numbers<[1], [0], [0], [1], [0, 0, 1, 1], [], []>} : vector<8x32xf32>, vector<32x128xf32>, vector<8x128xf32> -> vector<8x128xf32>
    %104 = vector.extract_strided_slice %9 {offsets = [40, 0], sizes = [8, 128], strides = [1, 1]} : vector<48x128xf32> to vector<8x128xf32>
    %105 = arith.addf %103, %104 : vector<8x128xf32>
    %106 = math.tanh %105 : vector<8x128xf32>
    %107 = vector.broadcast %0 : vector<1x128xf32> to vector<8x128xf32>
    %108 = arith.mulf %106, %107 : vector<8x128xf32>
    %109 = vector.broadcast %2 : vector<1x128xf32> to vector<8x128xf32>
    %110 = arith.addf %108, %109 : vector<8x128xf32>
    %111 = vector.extract_strided_slice %110 {offsets = [0, 0], sizes = [8, 32], strides = [1, 1]} : vector<8x128xf32> to vector<8x32xf32>
    %112 = vector.extract_strided_slice %110 {offsets = [0, 32], sizes = [8, 32], strides = [1, 1]} : vector<8x128xf32> to vector<8x32xf32>
    %113 = vector.extract_strided_slice %110 {offsets = [0, 64], sizes = [8, 32], strides = [1, 1]} : vector<8x128xf32> to vector<8x32xf32>
    %114 = vector.extract_strided_slice %110 {offsets = [0, 96], sizes = [8, 32], strides = [1, 1]} : vector<8x128xf32> to vector<8x32xf32>
    %115 = arith.mulf %112, %99 : vector<8x32xf32>
    %116 = arith.mulf %111, %113 : vector<8x32xf32>
    %117 = arith.addf %115, %116 : vector<8x32xf32>
    %118 = math.tanh %117 : vector<8x32xf32>
    %119 = arith.mulf %114, %118 : vector<8x32xf32>
    %120 = arith.maximumf %102, %119 : vector<8x32xf32>
    %121 = math.tanh %120 : vector<8x32xf32>
    %c0_19 = arith.constant 0 : index
    %c0_20 = arith.constant 0 : index
    %122 = vector.load %arg1[%c0_19, %c0_20] : memref<64x64xf32, #tpu.memory_space<vmem>>, vector<64x64xf32>
    %c0_21 = arith.constant 0 : index
    %c0_22 = arith.constant 0 : index
    %123 = vector.load %arg6[%c0_21, %c0_22] : memref<64x128xf32, #tpu.memory_space<vmem>>, vector<64x128xf32>
    %c0_23 = arith.constant 0 : index
    %c0_24 = arith.constant 0 : index
    %124 = vector.load %arg7[%c0_23, %c0_24] : memref<32x128xf32, #tpu.memory_space<vmem>>, vector<32x128xf32>
    %c0_25 = arith.constant 0 : index
    %c0_26 = arith.constant 0 : index
    %125 = vector.load %arg8[%c0_25, %c0_26] : memref<1x128xf32, #tpu.memory_space<vmem>>, vector<1x128xf32>
    %cst_27 = arith.constant dense<0.000000e+00> : vector<64x128xf32>
    %126 = tpu.matmul %122, %123, %cst_27 {dimension_numbers = #tpu.dot_dimension_numbers<[1], [0], [0], [1], [0, 0, 1, 1], [], []>} : vector<64x64xf32>, vector<64x128xf32>, vector<64x128xf32> -> vector<64x128xf32>
    %127 = vector.broadcast %125 : vector<1x128xf32> to vector<64x128xf32>
    %128 = arith.addf %126, %127 : vector<64x128xf32>
    %cst_28 = arith.constant 0.000000e+00 : f32
    %129 = vector.broadcast %cst_28 : f32 to vector<8x32xf32>
    %cst_29 = arith.constant 0.000000e+00 : f32
    %130 = vector.broadcast %cst_29 : f32 to vector<8x32xf32>
    %cst_30 = arith.constant -1.000000e+30 : f32
    %131 = vector.broadcast %cst_30 : f32 to vector<8x32xf32>
    %cst_31 = arith.constant dense<0.000000e+00> : vector<8x128xf32>
    %132 = tpu.matmul %129, %124, %cst_31 {dimension_numbers = #tpu.dot_dimension_numbers<[1], [0], [0], [1], [0, 0, 1, 1], [], []>} : vector<8x32xf32>, vector<32x128xf32>, vector<8x128xf32> -> vector<8x128xf32>
    %133 = vector.extract_strided_slice %128 {offsets = [0, 0], sizes = [8, 128], strides = [1, 1]} : vector<64x128xf32> to vector<8x128xf32>
    %134 = arith.addf %132, %133 : vector<8x128xf32>
    %135 = math.tanh %134 : vector<8x128xf32>
    %136 = vector.broadcast %0 : vector<1x128xf32> to vector<8x128xf32>
    %137 = arith.mulf %135, %136 : vector<8x128xf32>
    %138 = vector.broadcast %2 : vector<1x128xf32> to vector<8x128xf32>
    %139 = arith.addf %137, %138 : vector<8x128xf32>
    %140 = vector.extract_strided_slice %139 {offsets = [0, 0], sizes = [8, 32], strides = [1, 1]} : vector<8x128xf32> to vector<8x32xf32>
    %141 = vector.extract_strided_slice %139 {offsets = [0, 32], sizes = [8, 32], strides = [1, 1]} : vector<8x128xf32> to vector<8x32xf32>
    %142 = vector.extract_strided_slice %139 {offsets = [0, 64], sizes = [8, 32], strides = [1, 1]} : vector<8x128xf32> to vector<8x32xf32>
    %143 = vector.extract_strided_slice %139 {offsets = [0, 96], sizes = [8, 32], strides = [1, 1]} : vector<8x128xf32> to vector<8x32xf32>
    %144 = arith.mulf %141, %130 : vector<8x32xf32>
    %145 = arith.mulf %140, %142 : vector<8x32xf32>
    %146 = arith.addf %144, %145 : vector<8x32xf32>
    %147 = math.tanh %146 : vector<8x32xf32>
    %148 = arith.mulf %143, %147 : vector<8x32xf32>
    %149 = arith.maximumf %131, %148 : vector<8x32xf32>
    %cst_32 = arith.constant dense<0.000000e+00> : vector<8x128xf32>
    %150 = tpu.matmul %148, %124, %cst_32 {dimension_numbers = #tpu.dot_dimension_numbers<[1], [0], [0], [1], [0, 0, 1, 1], [], []>} : vector<8x32xf32>, vector<32x128xf32>, vector<8x128xf32> -> vector<8x128xf32>
    %151 = vector.extract_strided_slice %128 {offsets = [8, 0], sizes = [8, 128], strides = [1, 1]} : vector<64x128xf32> to vector<8x128xf32>
    %152 = arith.addf %150, %151 : vector<8x128xf32>
    %153 = math.tanh %152 : vector<8x128xf32>
    %154 = vector.broadcast %0 : vector<1x128xf32> to vector<8x128xf32>
    %155 = arith.mulf %153, %154 : vector<8x128xf32>
    %156 = vector.broadcast %2 : vector<1x128xf32> to vector<8x128xf32>
    %157 = arith.addf %155, %156 : vector<8x128xf32>
    %158 = vector.extract_strided_slice %157 {offsets = [0, 0], sizes = [8, 32], strides = [1, 1]} : vector<8x128xf32> to vector<8x32xf32>
    %159 = vector.extract_strided_slice %157 {offsets = [0, 32], sizes = [8, 32], strides = [1, 1]} : vector<8x128xf32> to vector<8x32xf32>
    %160 = vector.extract_strided_slice %157 {offsets = [0, 64], sizes = [8, 32], strides = [1, 1]} : vector<8x128xf32> to vector<8x32xf32>
    %161 = vector.extract_strided_slice %157 {offsets = [0, 96], sizes = [8, 32], strides = [1, 1]} : vector<8x128xf32> to vector<8x32xf32>
    %162 = arith.mulf %159, %146 : vector<8x32xf32>
    %163 = arith.mulf %158, %160 : vector<8x32xf32>
    %164 = arith.addf %162, %163 : vector<8x32xf32>
    %165 = math.tanh %164 : vector<8x32xf32>
    %166 = arith.mulf %161, %165 : vector<8x32xf32>
    %167 = arith.maximumf %149, %166 : vector<8x32xf32>
    %cst_33 = arith.constant dense<0.000000e+00> : vector<8x128xf32>
    %168 = tpu.matmul %166, %124, %cst_33 {dimension_numbers = #tpu.dot_dimension_numbers<[1], [0], [0], [1], [0, 0, 1, 1], [], []>} : vector<8x32xf32>, vector<32x128xf32>, vector<8x128xf32> -> vector<8x128xf32>
    %169 = vector.extract_strided_slice %128 {offsets = [16, 0], sizes = [8, 128], strides = [1, 1]} : vector<64x128xf32> to vector<8x128xf32>
    %170 = arith.addf %168, %169 : vector<8x128xf32>
    %171 = math.tanh %170 : vector<8x128xf32>
    %172 = vector.broadcast %0 : vector<1x128xf32> to vector<8x128xf32>
    %173 = arith.mulf %171, %172 : vector<8x128xf32>
    %174 = vector.broadcast %2 : vector<1x128xf32> to vector<8x128xf32>
    %175 = arith.addf %173, %174 : vector<8x128xf32>
    %176 = vector.extract_strided_slice %175 {offsets = [0, 0], sizes = [8, 32], strides = [1, 1]} : vector<8x128xf32> to vector<8x32xf32>
    %177 = vector.extract_strided_slice %175 {offsets = [0, 32], sizes = [8, 32], strides = [1, 1]} : vector<8x128xf32> to vector<8x32xf32>
    %178 = vector.extract_strided_slice %175 {offsets = [0, 64], sizes = [8, 32], strides = [1, 1]} : vector<8x128xf32> to vector<8x32xf32>
    %179 = vector.extract_strided_slice %175 {offsets = [0, 96], sizes = [8, 32], strides = [1, 1]} : vector<8x128xf32> to vector<8x32xf32>
    %180 = arith.mulf %177, %164 : vector<8x32xf32>
    %181 = arith.mulf %176, %178 : vector<8x32xf32>
    %182 = arith.addf %180, %181 : vector<8x32xf32>
    %183 = math.tanh %182 : vector<8x32xf32>
    %184 = arith.mulf %179, %183 : vector<8x32xf32>
    %185 = arith.maximumf %167, %184 : vector<8x32xf32>
    %cst_34 = arith.constant dense<0.000000e+00> : vector<8x128xf32>
    %186 = tpu.matmul %184, %124, %cst_34 {dimension_numbers = #tpu.dot_dimension_numbers<[1], [0], [0], [1], [0, 0, 1, 1], [], []>} : vector<8x32xf32>, vector<32x128xf32>, vector<8x128xf32> -> vector<8x128xf32>
    %187 = vector.extract_strided_slice %128 {offsets = [24, 0], sizes = [8, 128], strides = [1, 1]} : vector<64x128xf32> to vector<8x128xf32>
    %188 = arith.addf %186, %187 : vector<8x128xf32>
    %189 = math.tanh %188 : vector<8x128xf32>
    %190 = vector.broadcast %0 : vector<1x128xf32> to vector<8x128xf32>
    %191 = arith.mulf %189, %190 : vector<8x128xf32>
    %192 = vector.broadcast %2 : vector<1x128xf32> to vector<8x128xf32>
    %193 = arith.addf %191, %192 : vector<8x128xf32>
    %194 = vector.extract_strided_slice %193 {offsets = [0, 0], sizes = [8, 32], strides = [1, 1]} : vector<8x128xf32> to vector<8x32xf32>
    %195 = vector.extract_strided_slice %193 {offsets = [0, 32], sizes = [8, 32], strides = [1, 1]} : vector<8x128xf32> to vector<8x32xf32>
    %196 = vector.extract_strided_slice %193 {offsets = [0, 64], sizes = [8, 32], strides = [1, 1]} : vector<8x128xf32> to vector<8x32xf32>
    %197 = vector.extract_strided_slice %193 {offsets = [0, 96], sizes = [8, 32], strides = [1, 1]} : vector<8x128xf32> to vector<8x32xf32>
    %198 = arith.mulf %195, %182 : vector<8x32xf32>
    %199 = arith.mulf %194, %196 : vector<8x32xf32>
    %200 = arith.addf %198, %199 : vector<8x32xf32>
    %201 = math.tanh %200 : vector<8x32xf32>
    %202 = arith.mulf %197, %201 : vector<8x32xf32>
    %203 = arith.maximumf %185, %202 : vector<8x32xf32>
    %cst_35 = arith.constant dense<0.000000e+00> : vector<8x128xf32>
    %204 = tpu.matmul %202, %124, %cst_35 {dimension_numbers = #tpu.dot_dimension_numbers<[1], [0], [0], [1], [0, 0, 1, 1], [], []>} : vector<8x32xf32>, vector<32x128xf32>, vector<8x128xf32> -> vector<8x128xf32>
    %205 = vector.extract_strided_slice %128 {offsets = [32, 0], sizes = [8, 128], strides = [1, 1]} : vector<64x128xf32> to vector<8x128xf32>
    %206 = arith.addf %204, %205 : vector<8x128xf32>
    %207 = math.tanh %206 : vector<8x128xf32>
    %208 = vector.broadcast %0 : vector<1x128xf32> to vector<8x128xf32>
    %209 = arith.mulf %207, %208 : vector<8x128xf32>
    %210 = vector.broadcast %2 : vector<1x128xf32> to vector<8x128xf32>
    %211 = arith.addf %209, %210 : vector<8x128xf32>
    %212 = vector.extract_strided_slice %211 {offsets = [0, 0], sizes = [8, 32], strides = [1, 1]} : vector<8x128xf32> to vector<8x32xf32>
    %213 = vector.extract_strided_slice %211 {offsets = [0, 32], sizes = [8, 32], strides = [1, 1]} : vector<8x128xf32> to vector<8x32xf32>
    %214 = vector.extract_strided_slice %211 {offsets = [0, 64], sizes = [8, 32], strides = [1, 1]} : vector<8x128xf32> to vector<8x32xf32>
    %215 = vector.extract_strided_slice %211 {offsets = [0, 96], sizes = [8, 32], strides = [1, 1]} : vector<8x128xf32> to vector<8x32xf32>
    %216 = arith.mulf %213, %200 : vector<8x32xf32>
    %217 = arith.mulf %212, %214 : vector<8x32xf32>
    %218 = arith.addf %216, %217 : vector<8x32xf32>
    %219 = math.tanh %218 : vector<8x32xf32>
    %220 = arith.mulf %215, %219 : vector<8x32xf32>
    %221 = arith.maximumf %203, %220 : vector<8x32xf32>
    %cst_36 = arith.constant dense<0.000000e+00> : vector<8x128xf32>
    %222 = tpu.matmul %220, %124, %cst_36 {dimension_numbers = #tpu.dot_dimension_numbers<[1], [0], [0], [1], [0, 0, 1, 1], [], []>} : vector<8x32xf32>, vector<32x128xf32>, vector<8x128xf32> -> vector<8x128xf32>
    %223 = vector.extract_strided_slice %128 {offsets = [40, 0], sizes = [8, 128], strides = [1, 1]} : vector<64x128xf32> to vector<8x128xf32>
    %224 = arith.addf %222, %223 : vector<8x128xf32>
    %225 = math.tanh %224 : vector<8x128xf32>
    %226 = vector.broadcast %0 : vector<1x128xf32> to vector<8x128xf32>
    %227 = arith.mulf %225, %226 : vector<8x128xf32>
    %228 = vector.broadcast %2 : vector<1x128xf32> to vector<8x128xf32>
    %229 = arith.addf %227, %228 : vector<8x128xf32>
    %230 = vector.extract_strided_slice %229 {offsets = [0, 0], sizes = [8, 32], strides = [1, 1]} : vector<8x128xf32> to vector<8x32xf32>
    %231 = vector.extract_strided_slice %229 {offsets = [0, 32], sizes = [8, 32], strides = [1, 1]} : vector<8x128xf32> to vector<8x32xf32>
    %232 = vector.extract_strided_slice %229 {offsets = [0, 64], sizes = [8, 32], strides = [1, 1]} : vector<8x128xf32> to vector<8x32xf32>
    %233 = vector.extract_strided_slice %229 {offsets = [0, 96], sizes = [8, 32], strides = [1, 1]} : vector<8x128xf32> to vector<8x32xf32>
    %234 = arith.mulf %231, %218 : vector<8x32xf32>
    %235 = arith.mulf %230, %232 : vector<8x32xf32>
    %236 = arith.addf %234, %235 : vector<8x32xf32>
    %237 = math.tanh %236 : vector<8x32xf32>
    %238 = arith.mulf %233, %237 : vector<8x32xf32>
    %239 = arith.maximumf %221, %238 : vector<8x32xf32>
    %cst_37 = arith.constant dense<0.000000e+00> : vector<8x128xf32>
    %240 = tpu.matmul %238, %124, %cst_37 {dimension_numbers = #tpu.dot_dimension_numbers<[1], [0], [0], [1], [0, 0, 1, 1], [], []>} : vector<8x32xf32>, vector<32x128xf32>, vector<8x128xf32> -> vector<8x128xf32>
    %241 = vector.extract_strided_slice %128 {offsets = [48, 0], sizes = [8, 128], strides = [1, 1]} : vector<64x128xf32> to vector<8x128xf32>
    %242 = arith.addf %240, %241 : vector<8x128xf32>
    %243 = math.tanh %242 : vector<8x128xf32>
    %244 = vector.broadcast %0 : vector<1x128xf32> to vector<8x128xf32>
    %245 = arith.mulf %243, %244 : vector<8x128xf32>
    %246 = vector.broadcast %2 : vector<1x128xf32> to vector<8x128xf32>
    %247 = arith.addf %245, %246 : vector<8x128xf32>
    %248 = vector.extract_strided_slice %247 {offsets = [0, 0], sizes = [8, 32], strides = [1, 1]} : vector<8x128xf32> to vector<8x32xf32>
    %249 = vector.extract_strided_slice %247 {offsets = [0, 32], sizes = [8, 32], strides = [1, 1]} : vector<8x128xf32> to vector<8x32xf32>
    %250 = vector.extract_strided_slice %247 {offsets = [0, 64], sizes = [8, 32], strides = [1, 1]} : vector<8x128xf32> to vector<8x32xf32>
    %251 = vector.extract_strided_slice %247 {offsets = [0, 96], sizes = [8, 32], strides = [1, 1]} : vector<8x128xf32> to vector<8x32xf32>
    %252 = arith.mulf %249, %236 : vector<8x32xf32>
    %253 = arith.mulf %248, %250 : vector<8x32xf32>
    %254 = arith.addf %252, %253 : vector<8x32xf32>
    %255 = math.tanh %254 : vector<8x32xf32>
    %256 = arith.mulf %251, %255 : vector<8x32xf32>
    %257 = arith.maximumf %239, %256 : vector<8x32xf32>
    %cst_38 = arith.constant dense<0.000000e+00> : vector<8x128xf32>
    %258 = tpu.matmul %256, %124, %cst_38 {dimension_numbers = #tpu.dot_dimension_numbers<[1], [0], [0], [1], [0, 0, 1, 1], [], []>} : vector<8x32xf32>, vector<32x128xf32>, vector<8x128xf32> -> vector<8x128xf32>
    %259 = vector.extract_strided_slice %128 {offsets = [56, 0], sizes = [8, 128], strides = [1, 1]} : vector<64x128xf32> to vector<8x128xf32>
    %260 = arith.addf %258, %259 : vector<8x128xf32>
    %261 = math.tanh %260 : vector<8x128xf32>
    %262 = vector.broadcast %0 : vector<1x128xf32> to vector<8x128xf32>
    %263 = arith.mulf %261, %262 : vector<8x128xf32>
    %264 = vector.broadcast %2 : vector<1x128xf32> to vector<8x128xf32>
    %265 = arith.addf %263, %264 : vector<8x128xf32>
    %266 = vector.extract_strided_slice %265 {offsets = [0, 0], sizes = [8, 32], strides = [1, 1]} : vector<8x128xf32> to vector<8x32xf32>
    %267 = vector.extract_strided_slice %265 {offsets = [0, 32], sizes = [8, 32], strides = [1, 1]} : vector<8x128xf32> to vector<8x32xf32>
    %268 = vector.extract_strided_slice %265 {offsets = [0, 64], sizes = [8, 32], strides = [1, 1]} : vector<8x128xf32> to vector<8x32xf32>
    %269 = vector.extract_strided_slice %265 {offsets = [0, 96], sizes = [8, 32], strides = [1, 1]} : vector<8x128xf32> to vector<8x32xf32>
    %270 = arith.mulf %267, %254 : vector<8x32xf32>
    %271 = arith.mulf %266, %268 : vector<8x32xf32>
    %272 = arith.addf %270, %271 : vector<8x32xf32>
    %273 = math.tanh %272 : vector<8x32xf32>
    %274 = arith.mulf %269, %273 : vector<8x32xf32>
    %275 = arith.maximumf %257, %274 : vector<8x32xf32>
    %276 = math.tanh %275 : vector<8x32xf32>
    %c0_39 = arith.constant 0 : index
    %c0_40 = arith.constant 0 : index
    %277 = vector.load %arg2[%c0_39, %c0_40] : memref<64x64xf32, #tpu.memory_space<vmem>>, vector<64x64xf32>
    %c0_41 = arith.constant 0 : index
    %c0_42 = arith.constant 0 : index
    %278 = vector.load %arg9[%c0_41, %c0_42] : memref<64x128xf32, #tpu.memory_space<vmem>>, vector<64x128xf32>
    %c0_43 = arith.constant 0 : index
    %c0_44 = arith.constant 0 : index
    %279 = vector.load %arg10[%c0_43, %c0_44] : memref<32x128xf32, #tpu.memory_space<vmem>>, vector<32x128xf32>
    %c0_45 = arith.constant 0 : index
    %c0_46 = arith.constant 0 : index
    %280 = vector.load %arg11[%c0_45, %c0_46] : memref<1x128xf32, #tpu.memory_space<vmem>>, vector<1x128xf32>
    %cst_47 = arith.constant dense<0.000000e+00> : vector<64x128xf32>
    %281 = tpu.matmul %277, %278, %cst_47 {dimension_numbers = #tpu.dot_dimension_numbers<[1], [0], [0], [1], [0, 0, 1, 1], [], []>} : vector<64x64xf32>, vector<64x128xf32>, vector<64x128xf32> -> vector<64x128xf32>
    %282 = vector.broadcast %280 : vector<1x128xf32> to vector<64x128xf32>
    %283 = arith.addf %281, %282 : vector<64x128xf32>
    %cst_48 = arith.constant 0.000000e+00 : f32
    %284 = vector.broadcast %cst_48 : f32 to vector<8x32xf32>
    %cst_49 = arith.constant 0.000000e+00 : f32
    %285 = vector.broadcast %cst_49 : f32 to vector<8x32xf32>
    %cst_50 = arith.constant -1.000000e+30 : f32
    %286 = vector.broadcast %cst_50 : f32 to vector<8x32xf32>
    %cst_51 = arith.constant dense<0.000000e+00> : vector<8x128xf32>
    %287 = tpu.matmul %284, %279, %cst_51 {dimension_numbers = #tpu.dot_dimension_numbers<[1], [0], [0], [1], [0, 0, 1, 1], [], []>} : vector<8x32xf32>, vector<32x128xf32>, vector<8x128xf32> -> vector<8x128xf32>
    %288 = vector.extract_strided_slice %283 {offsets = [0, 0], sizes = [8, 128], strides = [1, 1]} : vector<64x128xf32> to vector<8x128xf32>
    %289 = arith.addf %287, %288 : vector<8x128xf32>
    %290 = math.tanh %289 : vector<8x128xf32>
    %291 = vector.broadcast %0 : vector<1x128xf32> to vector<8x128xf32>
    %292 = arith.mulf %290, %291 : vector<8x128xf32>
    %293 = vector.broadcast %2 : vector<1x128xf32> to vector<8x128xf32>
    %294 = arith.addf %292, %293 : vector<8x128xf32>
    %295 = vector.extract_strided_slice %294 {offsets = [0, 0], sizes = [8, 32], strides = [1, 1]} : vector<8x128xf32> to vector<8x32xf32>
    %296 = vector.extract_strided_slice %294 {offsets = [0, 32], sizes = [8, 32], strides = [1, 1]} : vector<8x128xf32> to vector<8x32xf32>
    %297 = vector.extract_strided_slice %294 {offsets = [0, 64], sizes = [8, 32], strides = [1, 1]} : vector<8x128xf32> to vector<8x32xf32>
    %298 = vector.extract_strided_slice %294 {offsets = [0, 96], sizes = [8, 32], strides = [1, 1]} : vector<8x128xf32> to vector<8x32xf32>
    %299 = arith.mulf %296, %285 : vector<8x32xf32>
    %300 = arith.mulf %295, %297 : vector<8x32xf32>
    %301 = arith.addf %299, %300 : vector<8x32xf32>
    %302 = math.tanh %301 : vector<8x32xf32>
    %303 = arith.mulf %298, %302 : vector<8x32xf32>
    %304 = arith.maximumf %286, %303 : vector<8x32xf32>
    %cst_52 = arith.constant dense<0.000000e+00> : vector<8x128xf32>
    %305 = tpu.matmul %303, %279, %cst_52 {dimension_numbers = #tpu.dot_dimension_numbers<[1], [0], [0], [1], [0, 0, 1, 1], [], []>} : vector<8x32xf32>, vector<32x128xf32>, vector<8x128xf32> -> vector<8x128xf32>
    %306 = vector.extract_strided_slice %283 {offsets = [8, 0], sizes = [8, 128], strides = [1, 1]} : vector<64x128xf32> to vector<8x128xf32>
    %307 = arith.addf %305, %306 : vector<8x128xf32>
    %308 = math.tanh %307 : vector<8x128xf32>
    %309 = vector.broadcast %0 : vector<1x128xf32> to vector<8x128xf32>
    %310 = arith.mulf %308, %309 : vector<8x128xf32>
    %311 = vector.broadcast %2 : vector<1x128xf32> to vector<8x128xf32>
    %312 = arith.addf %310, %311 : vector<8x128xf32>
    %313 = vector.extract_strided_slice %312 {offsets = [0, 0], sizes = [8, 32], strides = [1, 1]} : vector<8x128xf32> to vector<8x32xf32>
    %314 = vector.extract_strided_slice %312 {offsets = [0, 32], sizes = [8, 32], strides = [1, 1]} : vector<8x128xf32> to vector<8x32xf32>
    %315 = vector.extract_strided_slice %312 {offsets = [0, 64], sizes = [8, 32], strides = [1, 1]} : vector<8x128xf32> to vector<8x32xf32>
    %316 = vector.extract_strided_slice %312 {offsets = [0, 96], sizes = [8, 32], strides = [1, 1]} : vector<8x128xf32> to vector<8x32xf32>
    %317 = arith.mulf %314, %301 : vector<8x32xf32>
    %318 = arith.mulf %313, %315 : vector<8x32xf32>
    %319 = arith.addf %317, %318 : vector<8x32xf32>
    %320 = math.tanh %319 : vector<8x32xf32>
    %321 = arith.mulf %316, %320 : vector<8x32xf32>
    %322 = arith.maximumf %304, %321 : vector<8x32xf32>
    %cst_53 = arith.constant dense<0.000000e+00> : vector<8x128xf32>
    %323 = tpu.matmul %321, %279, %cst_53 {dimension_numbers = #tpu.dot_dimension_numbers<[1], [0], [0], [1], [0, 0, 1, 1], [], []>} : vector<8x32xf32>, vector<32x128xf32>, vector<8x128xf32> -> vector<8x128xf32>
    %324 = vector.extract_strided_slice %283 {offsets = [16, 0], sizes = [8, 128], strides = [1, 1]} : vector<64x128xf32> to vector<8x128xf32>
    %325 = arith.addf %323, %324 : vector<8x128xf32>
    %326 = math.tanh %325 : vector<8x128xf32>
    %327 = vector.broadcast %0 : vector<1x128xf32> to vector<8x128xf32>
    %328 = arith.mulf %326, %327 : vector<8x128xf32>
    %329 = vector.broadcast %2 : vector<1x128xf32> to vector<8x128xf32>
    %330 = arith.addf %328, %329 : vector<8x128xf32>
    %331 = vector.extract_strided_slice %330 {offsets = [0, 0], sizes = [8, 32], strides = [1, 1]} : vector<8x128xf32> to vector<8x32xf32>
    %332 = vector.extract_strided_slice %330 {offsets = [0, 32], sizes = [8, 32], strides = [1, 1]} : vector<8x128xf32> to vector<8x32xf32>
    %333 = vector.extract_strided_slice %330 {offsets = [0, 64], sizes = [8, 32], strides = [1, 1]} : vector<8x128xf32> to vector<8x32xf32>
    %334 = vector.extract_strided_slice %330 {offsets = [0, 96], sizes = [8, 32], strides = [1, 1]} : vector<8x128xf32> to vector<8x32xf32>
    %335 = arith.mulf %332, %319 : vector<8x32xf32>
    %336 = arith.mulf %331, %333 : vector<8x32xf32>
    %337 = arith.addf %335, %336 : vector<8x32xf32>
    %338 = math.tanh %337 : vector<8x32xf32>
    %339 = arith.mulf %334, %338 : vector<8x32xf32>
    %340 = arith.maximumf %322, %339 : vector<8x32xf32>
    %cst_54 = arith.constant dense<0.000000e+00> : vector<8x128xf32>
    %341 = tpu.matmul %339, %279, %cst_54 {dimension_numbers = #tpu.dot_dimension_numbers<[1], [0], [0], [1], [0, 0, 1, 1], [], []>} : vector<8x32xf32>, vector<32x128xf32>, vector<8x128xf32> -> vector<8x128xf32>
    %342 = vector.extract_strided_slice %283 {offsets = [24, 0], sizes = [8, 128], strides = [1, 1]} : vector<64x128xf32> to vector<8x128xf32>
    %343 = arith.addf %341, %342 : vector<8x128xf32>
    %344 = math.tanh %343 : vector<8x128xf32>
    %345 = vector.broadcast %0 : vector<1x128xf32> to vector<8x128xf32>
    %346 = arith.mulf %344, %345 : vector<8x128xf32>
    %347 = vector.broadcast %2 : vector<1x128xf32> to vector<8x128xf32>
    %348 = arith.addf %346, %347 : vector<8x128xf32>
    %349 = vector.extract_strided_slice %348 {offsets = [0, 0], sizes = [8, 32], strides = [1, 1]} : vector<8x128xf32> to vector<8x32xf32>
    %350 = vector.extract_strided_slice %348 {offsets = [0, 32], sizes = [8, 32], strides = [1, 1]} : vector<8x128xf32> to vector<8x32xf32>
    %351 = vector.extract_strided_slice %348 {offsets = [0, 64], sizes = [8, 32], strides = [1, 1]} : vector<8x128xf32> to vector<8x32xf32>
    %352 = vector.extract_strided_slice %348 {offsets = [0, 96], sizes = [8, 32], strides = [1, 1]} : vector<8x128xf32> to vector<8x32xf32>
    %353 = arith.mulf %350, %337 : vector<8x32xf32>
    %354 = arith.mulf %349, %351 : vector<8x32xf32>
    %355 = arith.addf %353, %354 : vector<8x32xf32>
    %356 = math.tanh %355 : vector<8x32xf32>
    %357 = arith.mulf %352, %356 : vector<8x32xf32>
    %358 = arith.maximumf %340, %357 : vector<8x32xf32>
    %cst_55 = arith.constant dense<0.000000e+00> : vector<8x128xf32>
    %359 = tpu.matmul %357, %279, %cst_55 {dimension_numbers = #tpu.dot_dimension_numbers<[1], [0], [0], [1], [0, 0, 1, 1], [], []>} : vector<8x32xf32>, vector<32x128xf32>, vector<8x128xf32> -> vector<8x128xf32>
    %360 = vector.extract_strided_slice %283 {offsets = [32, 0], sizes = [8, 128], strides = [1, 1]} : vector<64x128xf32> to vector<8x128xf32>
    %361 = arith.addf %359, %360 : vector<8x128xf32>
    %362 = math.tanh %361 : vector<8x128xf32>
    %363 = vector.broadcast %0 : vector<1x128xf32> to vector<8x128xf32>
    %364 = arith.mulf %362, %363 : vector<8x128xf32>
    %365 = vector.broadcast %2 : vector<1x128xf32> to vector<8x128xf32>
    %366 = arith.addf %364, %365 : vector<8x128xf32>
    %367 = vector.extract_strided_slice %366 {offsets = [0, 0], sizes = [8, 32], strides = [1, 1]} : vector<8x128xf32> to vector<8x32xf32>
    %368 = vector.extract_strided_slice %366 {offsets = [0, 32], sizes = [8, 32], strides = [1, 1]} : vector<8x128xf32> to vector<8x32xf32>
    %369 = vector.extract_strided_slice %366 {offsets = [0, 64], sizes = [8, 32], strides = [1, 1]} : vector<8x128xf32> to vector<8x32xf32>
    %370 = vector.extract_strided_slice %366 {offsets = [0, 96], sizes = [8, 32], strides = [1, 1]} : vector<8x128xf32> to vector<8x32xf32>
    %371 = arith.mulf %368, %355 : vector<8x32xf32>
    %372 = arith.mulf %367, %369 : vector<8x32xf32>
    %373 = arith.addf %371, %372 : vector<8x32xf32>
    %374 = math.tanh %373 : vector<8x32xf32>
    %375 = arith.mulf %370, %374 : vector<8x32xf32>
    %376 = arith.maximumf %358, %375 : vector<8x32xf32>
    %cst_56 = arith.constant dense<0.000000e+00> : vector<8x128xf32>
    %377 = tpu.matmul %375, %279, %cst_56 {dimension_numbers = #tpu.dot_dimension_numbers<[1], [0], [0], [1], [0, 0, 1, 1], [], []>} : vector<8x32xf32>, vector<32x128xf32>, vector<8x128xf32> -> vector<8x128xf32>
    %378 = vector.extract_strided_slice %283 {offsets = [40, 0], sizes = [8, 128], strides = [1, 1]} : vector<64x128xf32> to vector<8x128xf32>
    %379 = arith.addf %377, %378 : vector<8x128xf32>
    %380 = math.tanh %379 : vector<8x128xf32>
    %381 = vector.broadcast %0 : vector<1x128xf32> to vector<8x128xf32>
    %382 = arith.mulf %380, %381 : vector<8x128xf32>
    %383 = vector.broadcast %2 : vector<1x128xf32> to vector<8x128xf32>
    %384 = arith.addf %382, %383 : vector<8x128xf32>
    %385 = vector.extract_strided_slice %384 {offsets = [0, 0], sizes = [8, 32], strides = [1, 1]} : vector<8x128xf32> to vector<8x32xf32>
    %386 = vector.extract_strided_slice %384 {offsets = [0, 32], sizes = [8, 32], strides = [1, 1]} : vector<8x128xf32> to vector<8x32xf32>
    %387 = vector.extract_strided_slice %384 {offsets = [0, 64], sizes = [8, 32], strides = [1, 1]} : vector<8x128xf32> to vector<8x32xf32>
    %388 = vector.extract_strided_slice %384 {offsets = [0, 96], sizes = [8, 32], strides = [1, 1]} : vector<8x128xf32> to vector<8x32xf32>
    %389 = arith.mulf %386, %373 : vector<8x32xf32>
    %390 = arith.mulf %385, %387 : vector<8x32xf32>
    %391 = arith.addf %389, %390 : vector<8x32xf32>
    %392 = math.tanh %391 : vector<8x32xf32>
    %393 = arith.mulf %388, %392 : vector<8x32xf32>
    %394 = arith.maximumf %376, %393 : vector<8x32xf32>
    %cst_57 = arith.constant dense<0.000000e+00> : vector<8x128xf32>
    %395 = tpu.matmul %393, %279, %cst_57 {dimension_numbers = #tpu.dot_dimension_numbers<[1], [0], [0], [1], [0, 0, 1, 1], [], []>} : vector<8x32xf32>, vector<32x128xf32>, vector<8x128xf32> -> vector<8x128xf32>
    %396 = vector.extract_strided_slice %283 {offsets = [48, 0], sizes = [8, 128], strides = [1, 1]} : vector<64x128xf32> to vector<8x128xf32>
    %397 = arith.addf %395, %396 : vector<8x128xf32>
    %398 = math.tanh %397 : vector<8x128xf32>
    %399 = vector.broadcast %0 : vector<1x128xf32> to vector<8x128xf32>
    %400 = arith.mulf %398, %399 : vector<8x128xf32>
    %401 = vector.broadcast %2 : vector<1x128xf32> to vector<8x128xf32>
    %402 = arith.addf %400, %401 : vector<8x128xf32>
    %403 = vector.extract_strided_slice %402 {offsets = [0, 0], sizes = [8, 32], strides = [1, 1]} : vector<8x128xf32> to vector<8x32xf32>
    %404 = vector.extract_strided_slice %402 {offsets = [0, 32], sizes = [8, 32], strides = [1, 1]} : vector<8x128xf32> to vector<8x32xf32>
    %405 = vector.extract_strided_slice %402 {offsets = [0, 64], sizes = [8, 32], strides = [1, 1]} : vector<8x128xf32> to vector<8x32xf32>
    %406 = vector.extract_strided_slice %402 {offsets = [0, 96], sizes = [8, 32], strides = [1, 1]} : vector<8x128xf32> to vector<8x32xf32>
    %407 = arith.mulf %404, %391 : vector<8x32xf32>
    %408 = arith.mulf %403, %405 : vector<8x32xf32>
    %409 = arith.addf %407, %408 : vector<8x32xf32>
    %410 = math.tanh %409 : vector<8x32xf32>
    %411 = arith.mulf %406, %410 : vector<8x32xf32>
    %412 = arith.maximumf %394, %411 : vector<8x32xf32>
    %cst_58 = arith.constant dense<0.000000e+00> : vector<8x128xf32>
    %413 = tpu.matmul %411, %279, %cst_58 {dimension_numbers = #tpu.dot_dimension_numbers<[1], [0], [0], [1], [0, 0, 1, 1], [], []>} : vector<8x32xf32>, vector<32x128xf32>, vector<8x128xf32> -> vector<8x128xf32>
    %414 = vector.extract_strided_slice %283 {offsets = [56, 0], sizes = [8, 128], strides = [1, 1]} : vector<64x128xf32> to vector<8x128xf32>
    %415 = arith.addf %413, %414 : vector<8x128xf32>
    %416 = math.tanh %415 : vector<8x128xf32>
    %417 = vector.broadcast %0 : vector<1x128xf32> to vector<8x128xf32>
    %418 = arith.mulf %416, %417 : vector<8x128xf32>
    %419 = vector.broadcast %2 : vector<1x128xf32> to vector<8x128xf32>
    %420 = arith.addf %418, %419 : vector<8x128xf32>
    %421 = vector.extract_strided_slice %420 {offsets = [0, 0], sizes = [8, 32], strides = [1, 1]} : vector<8x128xf32> to vector<8x32xf32>
    %422 = vector.extract_strided_slice %420 {offsets = [0, 32], sizes = [8, 32], strides = [1, 1]} : vector<8x128xf32> to vector<8x32xf32>
    %423 = vector.extract_strided_slice %420 {offsets = [0, 64], sizes = [8, 32], strides = [1, 1]} : vector<8x128xf32> to vector<8x32xf32>
    %424 = vector.extract_strided_slice %420 {offsets = [0, 96], sizes = [8, 32], strides = [1, 1]} : vector<8x128xf32> to vector<8x32xf32>
    %425 = arith.mulf %422, %409 : vector<8x32xf32>
    %426 = arith.mulf %421, %423 : vector<8x32xf32>
    %427 = arith.addf %425, %426 : vector<8x32xf32>
    %428 = math.tanh %427 : vector<8x32xf32>
    %429 = arith.mulf %424, %428 : vector<8x32xf32>
    %430 = arith.maximumf %412, %429 : vector<8x32xf32>
    %431 = math.tanh %430 : vector<8x32xf32>
    %c0_59 = arith.constant 0 : index
    %c0_60 = arith.constant 0 : index
    %c0_61 = arith.constant 0 : index
    %432 = vector.load %arg13[%c0_59, %c0_60, %c0_61] : memref<10x8x32xf32, #tpu.memory_space<vmem>>, vector<10x8x32xf32>
    %cst_62 = arith.constant dense<0xFF800000> : vector<8x32xf32>
    %433 = vector.multi_reduction <maximumf>, %432, %cst_62 [0] : vector<10x8x32xf32> to vector<8x32xf32>
    %434 = math.tanh %433 : vector<8x32xf32>
    %c0_63 = arith.constant 0 : index
    %c0_64 = arith.constant 0 : index
    %435 = vector.load %arg14[%c0_63, %c0_64] : memref<96x32xf32, #tpu.memory_space<vmem>>, vector<96x32xf32>
    %436 = vector.extract_strided_slice %435 {offsets = [0, 0], sizes = [32, 32], strides = [1, 1]} : vector<96x32xf32> to vector<32x32xf32>
    %cst_65 = arith.constant dense<0.000000e+00> : vector<8x32xf32>
    %437 = tpu.matmul %121, %436, %cst_65 {dimension_numbers = #tpu.dot_dimension_numbers<[1], [0], [0], [1], [0, 0, 1, 1], [], []>} : vector<8x32xf32>, vector<32x32xf32>, vector<8x32xf32> -> vector<8x32xf32>
    %438 = vector.extract_strided_slice %435 {offsets = [32, 0], sizes = [32, 32], strides = [1, 1]} : vector<96x32xf32> to vector<32x32xf32>
    %cst_66 = arith.constant dense<0.000000e+00> : vector<8x32xf32>
    %439 = tpu.matmul %276, %438, %cst_66 {dimension_numbers = #tpu.dot_dimension_numbers<[1], [0], [0], [1], [0, 0, 1, 1], [], []>} : vector<8x32xf32>, vector<32x32xf32>, vector<8x32xf32> -> vector<8x32xf32>
    %440 = arith.addf %437, %439 : vector<8x32xf32>
    %441 = vector.extract_strided_slice %435 {offsets = [64, 0], sizes = [32, 32], strides = [1, 1]} : vector<96x32xf32> to vector<32x32xf32>
    %cst_67 = arith.constant dense<0.000000e+00> : vector<8x32xf32>
    %442 = tpu.matmul %434, %441, %cst_67 {dimension_numbers = #tpu.dot_dimension_numbers<[1], [0], [0], [1], [0, 0, 1, 1], [], []>} : vector<8x32xf32>, vector<32x32xf32>, vector<8x32xf32> -> vector<8x32xf32>
    %443 = arith.addf %440, %442 : vector<8x32xf32>
    %c0_68 = arith.constant 0 : index
    %c0_69 = arith.constant 0 : index
    %444 = vector.load %arg15[%c0_68, %c0_69] : memref<1x32xf32, #tpu.memory_space<vmem>>, vector<1x32xf32>
    %445 = vector.broadcast %444 : vector<1x32xf32> to vector<8x32xf32>
    %446 = arith.addf %443, %445 : vector<8x32xf32>
    %447 = math.tanh %446 : vector<8x32xf32>
    %448 = vector.extract_strided_slice %447 {offsets = [0, 0], sizes = [2, 32], strides = [1, 1]} : vector<8x32xf32> to vector<2x32xf32>
    %449 = vector.extract_strided_slice %431 {offsets = [0, 0], sizes = [2, 32], strides = [1, 1]} : vector<8x32xf32> to vector<2x32xf32>
    %450 = vector.extract_strided_slice %431 {offsets = [2, 0], sizes = [2, 32], strides = [1, 1]} : vector<8x32xf32> to vector<2x32xf32>
    %451 = arith.mulf %448, %448 : vector<2x32xf32>
    %cst_70 = arith.constant dense<0.000000e+00> : vector<2xf32>
    %452 = vector.multi_reduction <add>, %451, %cst_70 [1] : vector<2x32xf32> to vector<2xf32>
    %453 = vector.shape_cast %452 : vector<2xf32> to vector<2x1xf32>
    %454 = arith.mulf %449, %449 : vector<2x32xf32>
    %cst_71 = arith.constant dense<0.000000e+00> : vector<2xf32>
    %455 = vector.multi_reduction <add>, %454, %cst_71 [1] : vector<2x32xf32> to vector<2xf32>
    %456 = vector.shape_cast %455 : vector<2xf32> to vector<2x1xf32>
    %457 = arith.mulf %450, %450 : vector<2x32xf32>
    %cst_72 = arith.constant dense<0.000000e+00> : vector<2xf32>
    %458 = vector.multi_reduction <add>, %457, %cst_72 [1] : vector<2x32xf32> to vector<2xf32>
    %459 = vector.shape_cast %458 : vector<2xf32> to vector<2x1xf32>
    %460 = arith.mulf %448, %449 : vector<2x32xf32>
    %cst_73 = arith.constant dense<0.000000e+00> : vector<2xf32>
    %461 = vector.multi_reduction <add>, %460, %cst_73 [1] : vector<2x32xf32> to vector<2xf32>
    %462 = vector.shape_cast %461 : vector<2xf32> to vector<2x1xf32>
    %463 = arith.mulf %453, %456 : vector<2x1xf32>
    %cst_74 = arith.constant 1.000000e-16 : f32
    %464 = vector.broadcast %cst_74 : f32 to vector<2x1xf32>
    %465 = arith.maximumf %463, %464 : vector<2x1xf32>
    %466 = math.rsqrt %465 : vector<2x1xf32>
    %467 = arith.mulf %462, %466 : vector<2x1xf32>
    %468 = arith.mulf %448, %450 : vector<2x32xf32>
    %cst_75 = arith.constant dense<0.000000e+00> : vector<2xf32>
    %469 = vector.multi_reduction <add>, %468, %cst_75 [1] : vector<2x32xf32> to vector<2xf32>
    %470 = vector.shape_cast %469 : vector<2xf32> to vector<2x1xf32>
    %471 = arith.mulf %453, %459 : vector<2x1xf32>
    %cst_76 = arith.constant 1.000000e-16 : f32
    %472 = vector.broadcast %cst_76 : f32 to vector<2x1xf32>
    %473 = arith.maximumf %471, %472 : vector<2x1xf32>
    %474 = math.rsqrt %473 : vector<2x1xf32>
    %475 = arith.mulf %470, %474 : vector<2x1xf32>
    %cst_77 = arith.constant 5.000000e-02 : f32
    %476 = vector.broadcast %cst_77 : f32 to vector<2x1xf32>
    %477 = arith.subf %476, %467 : vector<2x1xf32>
    %478 = arith.addf %477, %475 : vector<2x1xf32>
    %cst_78 = arith.constant 9.99999997E-7 : f32
    %479 = vector.broadcast %cst_78 : f32 to vector<2x1xf32>
    %480 = arith.maximumf %478, %479 : vector<2x1xf32>
    %481 = vector.shape_cast %480 : vector<2x1xf32> to vector<2x1xf32>
    %482 = vector.broadcast %481 : vector<2x1xf32> to vector<2x128xf32>
    %c0_79 = arith.constant 0 : index
    %c0_80 = arith.constant 0 : index
    %483 = vector.load %arg16[%c0_79, %c0_80] : memref<2x128xf32, #tpu.memory_space<vmem>>, vector<2x128xf32>
    tpu.vector_store %arg16[%c0_79, %c0_80], %482 {strides = array<i32>} : memref<2x128xf32, #tpu.memory_space<vmem>>, vector<2x128xf32>,
    return
  }
}

</mosaic_0001>

<bundles_post_ra>
// kernel: joint_embedder_forward.1
= control target key start
LH: loop header
LB: loop body
LE: loop exit
PB: predicated region body
PF: predicated region fallthrough
CT: control target
= control target key end

     0   :  { %v3836_v3 = vmov 0.0|0.0   ;;  %vm3837_vm0 = vmmov 0   ;;  %v3838_v4 = vmov 0.0   ;;  %vm80_vm1 = vcmask 523264   ;;  %s3840_s24 = smov 32   ;;  %s4654_s3 = inlined_call_operand.vmem [shape: f32[64,128], index: 3, kind: input, shape index: {}]   ;;  %s4655_s4 = inlined_call_operand.vmem [shape: f32[32,128], index: 4, kind: input, shape index: {}]   ;;  %s4656_s0 = inlined_call_operand.vmem [shape: f32[48,64], index: 0, kind: input, shape index: {}]   ;;  %s4657_s5 = inlined_call_operand.vmem [shape: f32[1,128], index: 5, kind: input, shape index: {}]   ;;  %s4658_s12 = inlined_call_operand.vmem [shape: f32[1,128], index: 12, kind: input, shape index: {}]   ;;  %s4659_s6 = inlined_call_operand.vmem [shape: f32[64,128], index: 6, kind: input, shape index: {}]   ;;  %s4660_s7 = inlined_call_operand.vmem [shape: f32[32,128], index: 7, kind: input, shape index: {}]   ;;  %s4661_s1 = inlined_call_operand.vmem [shape: f32[64,64], index: 1, kind: input, shape index: {}]   ;;  %s4662_s8 = inlined_call_operand.vmem [shape: f32[1,128], index: 8, kind: input, shape index: {}]   ;;  %s4663_s9 = inlined_call_operand.vmem [shape: f32[64,128], index: 9, kind: input, shape index: {}]   ;;  %s4664_s10 = inlined_call_operand.vmem [shape: f32[32,128], index: 10, kind: input, shape index: {}]   ;;  %s4665_s2 = inlined_call_operand.vmem [shape: f32[64,64], index: 2, kind: input, shape index: {}]   ;;  %s4666_s11 = inlined_call_operand.vmem [shape: f32[1,128], index: 11, kind: input, shape index: {}]   ;;  %s4667_s14 = inlined_call_operand.vmem [shape: f32[96,32], index: 14, kind: input, shape index: {}]   ;;  %s4668_s13 = inlined_call_operand.vmem [shape: f32[10,8,32], index: 13, kind: input, shape index: {}]   ;;  %s4669_s15 = inlined_call_operand.vmem [shape: f32[1,32], index: 15, kind: input, shape index: {}]   ;;  %s4670_s16 = inlined_call_operand.vmem [shape: f32[2,128], index: 16, kind: output, shape index: {}]  }
   0x1   :  { %4672 = sst [smem:[#allocation2_spill]] %s4654_s3  ;;  %3545 = vmatprep.subr.bf16.mxu1 %v3836_v3  ;;  %3206 = vmatprep.mubr.msk.f32.mxu1 %vm3837_vm0, %v3838_v4  ;;  %v69_v10 = vld [vmem:[%s4655_s4] sm:$0xff]  ;;  %v70_v11 = vld [vmem:[%s4655_s4 + $0x8] sm:$0xff]  ;;  %v71_v14 = vld [vmem:[%s4655_s4 + $0x10] sm:$0xff]  ;;  %v270_v27 = vlaneseq  ;;  %vm194_vm2 = vcmask 261120   ;;  %vm2898_vm3 = vcmask 254976  }
   0x2   :  { %s4673_s23 = sld [smem:[#allocation2_spill]]  ;;  %v3954_v12 = vpack.c.bf16 %v70_v11, %v69_v10  ;;  %v55_v13 = vld [vmem:[%s4656_s0] sm:$0xff]  ;;  %v72_v15 = vld [vmem:[%s4655_s4 + $0x18] sm:$0xff]  ;;  %v56_v21 = vld [vmem:[%s4656_s0 + $0x8] sm:$0xff]  ;;  %vm2910_vm4 = vcmask 257026  }
   0x3   :  { %3189 = vmatprep.mubr.msk.f32.mxu0 %vm80_vm1, %v55_v13  ;;  %v3967_v17 = vpack.c.bf16 %v72_v15, %v71_v14  ;;  %v3997_v24 = vld [vmem:[%s4657_s5] ss:$0 sm:$0xff]  ;;  %v271_v30 = vshrl.u32 %v270_v27, 7  ;;  %s3839_s5 = smov 64   ;;  %v57_v60 = vld [vmem:[%s4656_s0 + $0x10] sm:$0xff]  ;;  %v58_v61 = vld [vmem:[%s4656_s0 + $0x18] sm:$0xff] }
   0x4   :  { %3547 = vmatpush3.bf16.msra.mxu1 %v3954_v12  ;;  %v53_v31 = vld [vmem:[%s4658_s12] sm:$0x1] }
   0x5   :  { %3548 = vmatprep.subr.bf16.mxu1 %v3836_v3  ;;  %v272_v32 = vsub.s32 0, %v271_v30  ;;  %v54_v33 = vsub.f32 1.0, %v53_v31 }
   0x7   :  { %v4003_v34 = vrot.slane %v53_v31, %v272_v32  ;;  %v4005_v35 = vrot.slane %v54_v33, %v272_v32 }
   0x8   :  { %v61_v0 = vld [vmem:[%s4673_s23] sm:$0xff]  ;;  %v62_v1 = vld [vmem:[%s4673_s23 + $0x8] sm:$0xff]  ;;  %v63_v2 = vld [vmem:[%s4673_s23 + $0x10] sm:$0xff]  ;;  %3550 = vmatpush3.bf16.msra.mxu1 %v3967_v17 }
   0x9   :  { %v3529_v5 = vpack.c.bf16 %v62_v1, %v61_v0  ;;  %v64_v6 = vld [vmem:[%s4673_s23 + $0x18] sm:$0xff]  ;;  %v65_v7 = vld [vmem:[%s4673_s23 + $0x20] sm:$0xff]  ;;  %v66_v9 = vld [vmem:[%s4673_s23 + $0x28] sm:$0xff]  ;;  %3551 = vmatprep.subr.bf16.mxu1 %v3836_v3 }
   0xa   :  { %v3533_v8 = vpack.c.bf16 %v64_v6, %v63_v2  ;;  %v3537_v16 = vpack.c.bf16 %v66_v9, %v65_v7  ;;  %v67_v18 = vld [vmem:[%s4673_s23 + $0x30] sm:$0xff]  ;;  %v68_v19 = vld [vmem:[%s4673_s23 + $0x38] sm:$0xff] }
   0xb   :  { %3530 = vmatprep.subr.bf16.mxu0 %v3529_v5  ;;  %v3541_v20 = vpack.c.bf16 %v68_v19, %v67_v18  ;;  %3207 = vmatmul.mubr.f32.vlgmr.msra.gmra.mrb[0].mxu1 %v3838_v4 }
   0xc   :  { %3532 = vmatpush3.bf16.msra.mxu0 %v3529_v5  ;;  %3553 = vmatpush3.bf16.msra.mxu1 %v3954_v12 }
   0xd   :  { %3534 = vmatprep.subr.bf16.mxu0 %v3533_v8  ;;  %3554 = vmatprep.subr.bf16.mxu1 %v3836_v3 }
   0xe   :  { %3217 = vmatprep.mubr.msk.f32.mxu1 %vm3837_vm0, %v3838_v4 }
  0x10   :  { %3536 = vmatpush3.bf16.msra.mxu0 %v3533_v8  ;;  %3556 = vmatpush3.bf16.msra.mxu1 %v3967_v17 }
  0x11   :  { %3538 = vmatprep.subr.bf16.mxu0 %v3537_v16  ;;  %3557 = vmatprep.subr.bf16.mxu1 %v3836_v3 }
  0x14   :  { %3540 = vmatpush3.bf16.msra.mxu0 %v3537_v16 }
  0x15   :  { %3542 = vmatprep.subr.bf16.mxu0 %v3541_v20 }
  0x18   :  { %3544 = vmatpush3.bf16.msra.mxu0 %v3541_v20 }
  0x19   :  { %3563 = vmatprep.subr.bf16.mxu0 %v3836_v3 }
  0x1b   :  { %3190 = vmatmul.mubr.msk.f32.vlgmr.msra.gmra.mrb[0].mxu0 %vm80_vm1, %v56_v21 }
  0x1c   :  { %3565 = vmatpush3.bf16.msra.mxu0 %v3954_v12  ;;  %3192 = vmatprep.mubr.msk.f32.mxu0 %vm80_vm1, %v57_v60 }
  0x1d   :  { %3566 = vmatprep.subr.bf16.mxu0 %v3836_v3 }
  0x1f   :  { %3193 = vmatmul.mubr.msk.f32.gmra.mrb[2].mxu0 %vm80_vm1, %v58_v61  ;;  %v790_v61 = vld [vmem:[%s4659_s6] sm:$0xff] }
  0x20   :  { %3568 = vmatpush3.bf16.msra.mxu0 %v3967_v17 }
  0x21   :  { %3575 = vmatprep.subr.bf16.mxu0 %v3836_v3 }
  0xde   :  { %v264_v22 = vpop.f32.mrb[0].mxu1 }
  0xdf   :  { %v3208_v23 = vpop.f32.mrb[1].mxu1 }
  0xe0   :  { %v60_v23 = vld [vmem:[%s4656_s0 + $0x28] sm:$0xff] }
  0xee   :  { %v3191_v25 = vpop.f32.mrb[0].mxu0 }
  0xef   :  { %v165_v26 = vpop.f32.mrb[1].mxu0  ;;  %v171_v48 = vadd.f32 %v3191_v25, %v3997_v24 }
  0xf0   :  { %v166_v28 = vadd.f32 %v3997_v24, %v165_v26 }
  0xf2   :  { %v265_v29 = vadd.f32 %v264_v22, %v166_v28  ;;  %v3194_v5 = vpop.f32.mrb[2].mxu0  ;;  %v59_v22 = vld [vmem:[%s4656_s0 + $0x20] sm:$0xff] }
  0xf3   :  { %v175_v6 = vpop.f32.mrb[3].mxu0  ;;  %3195 = vmatprep.mubr.msk.f32.mxu0 %vm80_vm1, %v59_v22  ;;  %v181_v32 = vadd.f32 %v3194_v5, %v3997_v24  ;;  %v794_v5 = vld [vmem:[%s4659_s6 + $0x20] sm:$0xff] }
  0xf4   :  { %3734 = vtanh.f32 %v265_v29  ;;  %v176_v8 = vadd.f32 %v3997_v24, %v175_v6  ;;  %3196 = vmatmul.mubr.msk.f32.gmra.mrb[4].mxu0 %vm80_vm1, %v60_v23  ;;  %v795_v6 = vld [vmem:[%s4659_s6 + $0x28] sm:$0xff] }
  0xf5   :  { %3239 = vmatprep.mubr.msk.f32.mxu0 %vm3837_vm0, %v3838_v4 }
  0xfe   :  { %v3735_v36 = vpop.eup %3734 }
  0xff   :  { %v275_v37 = vmul.f32 %v3735_v36, %v4003_v34 }
 0x101   :  { %v282_v38 = vadd.f32 %v4005_v35, %v275_v37 }
 0x103   :  { %285 = vrot.lane.b32.xlu0 %v282_v38, %s3839_s5  ;;  %v283_v41 = vmul.f32 0.0, %v282_v38 }
 0x175   :  { %v286_v39 = vpop.permute.xlu0 %285 }
 0x176   :  { %v288_v40 = vmul.f32 %v286_v39, %v282_v38 }
 0x178   :  { %290 = vrot.lane.b32.xlu0 %v288_v40, %s3840_s24 }
 0x1c7   :  { %v4061_v29 = vpop.f32.mrb[4].mxu0 }
 0x1c8   :  { %v185_v30 = vpop.f32.mrb[5].mxu0 }
 0x1ea   :  { %v291_v42 = vpop.permute.xlu0 %290 }
 0x1eb   :  { %v293_v43 = vadd.f32 %v291_v42, %v283_v41 }
 0x1ed   :  { %3736 = vtanh.f32 %v293_v43 }
 0x1f7   :  { %v3737_v44 = vpop.eup %3736 }
 0x1f8   :  { %296 = vrot.lane.b32.xlu1 %v3737_v44, %s3839_s5 }
 0x26a   :  { %v297_v45 = vpop.permute.xlu1 %296 }
 0x26b   :  { %v299_v46 = vmul.f32 %v297_v45, %v282_v38 }
 0x26d   :  { %302 = vrot.lane.b32.xlu1 %v299_v46, %s3840_s24  ;;  %v300_v0 = vmax.f32 %v299_v46, -1e+30 }
 0x2df   :  { %v303_v47 = vpop.permute.xlu1 %302 }
 0x2e0   :  { %3218 = vmatmul.mubr.msk.f32.vlgmr.msra.gmra.mrb[2].mxu1 %vm194_vm2, %v303_v47 }
 0x2e1   :  { %3559 = vmatpush3.bf16.msra.mxu1 %v3954_v12  ;;  %3228 = vmatprep.mubr.msk.f32.mxu1 %vm3837_vm0, %v3838_v4 }
 0x2e2   :  { %3560 = vmatprep.subr.bf16.mxu1 %v3836_v3 }
 0x2e5   :  { %3562 = vmatpush3.bf16.msra.mxu1 %v3967_v17 }
 0x2e6   :  { %3569 = vmatprep.subr.bf16.mxu1 %v3836_v3 }
 0x3b3   :  { %v372_v49 = vpop.f32.mrb[2].mxu1 }
 0x3b4   :  { %v373_v50 = vadd.f32 %v372_v49, %v171_v48  ;;  %v3219_v51 = vpop.f32.mrb[3].mxu1  ;;  %v186_v49 = vadd.f32 %v3997_v24, %v185_v30  ;;  %v191_v30 = vadd.f32 %v4061_v29, %v3997_v24 }
 0x3b6   :  { %3738 = vtanh.f32 %v373_v50 }
 0x3c0   :  { %v3739_v52 = vpop.eup %3738 }
 0x3c1   :  { %v377_v53 = vmul.f32 %v3739_v52, %v4003_v34 }
 0x3c3   :  { %v378_v54 = vadd.f32 %v377_v53, %v4005_v35 }
 0x3c5   :  { %381 = vrot.lane.b32.xlu0 %v378_v54, %s3839_s5  ;;  %v379_v57 = vmul.f32 %v378_v54, %v293_v43 }
 0x437   :  { %v382_v55 = vpop.permute.xlu0 %381 }
 0x438   :  { %v384_v56 = vmul.f32 %v382_v55, %v378_v54 }
 0x43a   :  { %386 = vrot.lane.b32.xlu1 %v384_v56, %s3840_s24 }
 0x4ac   :  { %v387_v58 = vpop.permute.xlu1 %386 }
 0x4ad   :  { %v389_v59 = vadd.f32 %v387_v58, %v379_v57 }
 0x4af   :  { %3740 = vtanh.f32 %v389_v59 }
 0x4b9   :  { %v3741_v62 = vpop.eup %3740 }
 0x4ba   :  { %392 = vrot.lane.b32.xlu0 %v3741_v62, %s3839_s5  ;;  %v791_v62 = vld [vmem:[%s4659_s6 + $0x8] sm:$0xff] }
 0x52c   :  { %v393_v63 = vpop.permute.xlu0 %392 }
 0x52d   :  { %v395_v1 = vmul.f32 %v393_v63, %v378_v54  ;;  %v792_v63 = vld [vmem:[%s4659_s6 + $0x10] sm:$0xff] }
 0x52f   :  { %v4034_v2 = vmax.f32 %v300_v0, %v395_v1  ;;  %398 = vrot.lane.b32.xlu1 %v395_v1, %s3840_s24  ;;  %v3581_v0 = vpack.c.bf16 %v791_v62, %v790_v61  ;;  %v793_v1 = vld [vmem:[%s4659_s6 + $0x18] sm:$0xff] }
 0x5a1   :  { %v399_v7 = vpop.permute.xlu1 %398 }
 0x5a2   :  { %3229 = vmatmul.mubr.msk.f32.vlgmr.msra.gmra.mrb[4].mxu1 %vm194_vm2, %v399_v7  ;;  %v3589_v7 = vpack.c.bf16 %v795_v6, %v794_v5 }
 0x5a3   :  { %3571 = vmatpush3.bf16.msra.mxu1 %v3954_v12  ;;  %3250 = vmatprep.mubr.msk.f32.mxu1 %vm3837_vm0, %v3838_v4 }
 0x5a4   :  { %3572 = vmatprep.subr.bf16.mxu1 %v3836_v3 }
 0x5a7   :  { %3574 = vmatpush3.bf16.msra.mxu1 %v3967_v17 }
 0x5a8   :  { %3582 = vmatprep.subr.bf16.mxu1 %v3581_v0 }
 0x675   :  { %v468_v9 = vpop.f32.mrb[4].mxu1 }
 0x676   :  { %v469_v10 = vadd.f32 %v468_v9, %v176_v8  ;;  %v3230_v11 = vpop.f32.mrb[5].mxu1  ;;  %v796_v8 = vld [vmem:[%s4659_s6 + $0x30] sm:$0xff]  ;;  %v797_v9 = vld [vmem:[%s4659_s6 + $0x38] sm:$0xff] }
 0x677   :  { %v3593_v11 = vpack.c.bf16 %v797_v9, %v796_v8 }
 0x678   :  { %3742 = vtanh.f32 %v469_v10 }
 0x682   :  { %v3743_v13 = vpop.eup %3742 }
 0x683   :  { %v473_v14 = vmul.f32 %v3743_v13, %v4003_v34  ;;  %v798_v13 = vld [vmem:[%s4660_s7] sm:$0xff] }
 0x685   :  { %v474_v15 = vadd.f32 %v473_v14, %v4005_v35  ;;  %v799_v14 = vld [vmem:[%s4660_s7 + $0x8] sm:$0xff] }
 0x687   :  { %477 = vrot.lane.b32.xlu0 %v474_v15, %s3839_s5  ;;  %v475_v19 = vmul.f32 %v474_v15, %v389_v59 }
 0x6f9   :  { %v478_v16 = vpop.permute.xlu0 %477 }
 0x6fa   :  { %v480_v18 = vmul.f32 %v478_v16, %v474_v15  ;;  %v783_v16 = vld [vmem:[%s4661_s1 + $0x8] sm:$0xff] }
 0x6fc   :  { %482 = vrot.lane.b32.xlu1 %v480_v18, %s3840_s24  ;;  %v4126_v18 = vpack.c.bf16 %v799_v14, %v798_v13 }
 0x76e   :  { %v483_v20 = vpop.permute.xlu1 %482 }
 0x76f   :  { %v485_v21 = vadd.f32 %v483_v20, %v475_v19  ;;  %v800_v19 = vld [vmem:[%s4660_s7 + $0x10] sm:$0xff]  ;;  %v801_v20 = vld [vmem:[%s4660_s7 + $0x18] sm:$0xff] }
 0x771   :  { %3744 = vtanh.f32 %v485_v21 }
 0x77b   :  { %v3745_v25 = vpop.eup %3744 }
 0x77c   :  { %488 = vrot.lane.b32.xlu0 %v3745_v25, %s3839_s5 }
 0x7ee   :  { %v489_v26 = vpop.permute.xlu0 %488 }
 0x7ef   :  { %v491_v27 = vmul.f32 %v489_v26, %v474_v15  ;;  %v782_v15 = vld [vmem:[%s4661_s1] sm:$0xff] }
 0x7f1   :  { %v492_v28 = vmax.f32 %v4034_v2, %v491_v27  ;;  %494 = vrot.lane.b32.xlu1 %v491_v27, %s3840_s24  ;;  %v3585_v2 = vpack.c.bf16 %v793_v1, %v792_v63  ;;  %v784_v63 = vld [vmem:[%s4661_s1 + $0x10] sm:$0xff] }
 0x863   :  { %v495_v31 = vpop.permute.xlu1 %494 }
 0x864   :  { %3240 = vmatmul.mubr.msk.f32.vlgmr.msra.gmra.mrb[6].mxu0 %vm194_vm2, %v495_v31 }
 0x865   :  { %3577 = vmatpush3.bf16.msra.mxu0 %v3954_v12  ;;  %3261 = vmatprep.mubr.msk.f32.mxu0 %vm3837_vm0, %v3838_v4 }
 0x866   :  { %3578 = vmatprep.subr.bf16.mxu0 %v3836_v3 }
 0x869   :  { %3580 = vmatpush3.bf16.msra.mxu0 %v3967_v17 }
 0x86a   :  { %3597 = vmatprep.subr.bf16.mxu0 %v3836_v3 }
 0x937   :  { %v564_v33 = vpop.f32.mrb[6].mxu0 }
 0x938   :  { %v565_v36 = vadd.f32 %v564_v33, %v181_v32  ;;  %v3241_v37 = vpop.f32.mrb[7].mxu0 }
 0x93a   :  { %3746 = vtanh.f32 %v565_v36  ;;  %v4169_v36 = vld [vmem:[%s4662_s8] ss:$0 sm:$0xff] }
 0x944   :  { %v3747_v38 = vpop.eup %3746 }
 0x945   :  { %v569_v39 = vmul.f32 %v3747_v38, %v4003_v34 }
 0x947   :  { %v570_v12 = vadd.f32 %v569_v39, %v4005_v35 }
 0x949   :  { %573 = vrot.lane.b32.xlu0 %v570_v12, %s3839_s5  ;;  %v571_v17 = vmul.f32 %v570_v12, %v485_v21  ;;  %v4138_v21 = vpack.c.bf16 %v801_v20, %v800_v19 }
 0x9bb   :  { %v574_v40 = vpop.permute.xlu0 %573 }
 0x9bc   :  { %v576_v41 = vmul.f32 %v574_v40, %v570_v12 }
 0x9be   :  { %578 = vrot.lane.b32.xlu1 %v576_v41, %s3840_s24 }
 0xa30   :  { %v579_v42 = vpop.permute.xlu1 %578 }
 0xa31   :  { %v581_v43 = vadd.f32 %v579_v42, %v571_v17 }
 0xa33   :  { %3748 = vtanh.f32 %v581_v43 }
 0xa3d   :  { %v3749_v44 = vpop.eup %3748 }
 0xa3e   :  { %584 = vrot.lane.b32.xlu0 %v3749_v44, %s3839_s5 }
 0xab0   :  { %v585_v45 = vpop.permute.xlu0 %584 }
 0xab1   :  { %v587_v46 = vmul.f32 %v585_v45, %v570_v12 }
 0xab3   :  { %v4076_v47 = vmax.f32 %v492_v28, %v587_v46  ;;  %590 = vrot.lane.b32.xlu1 %v587_v46, %s3840_s24 }
 0xb25   :  { %v591_v48 = vpop.permute.xlu1 %590 }
 0xb26   :  { %3251 = vmatmul.mubr.msk.f32.vlgmr.msra.gmra.mrb[6].mxu1 %vm194_vm2, %v591_v48 }
 0xb27   :  { %3584 = vmatpush3.bf16.msra.mxu1 %v3581_v0  ;;  %3280 = vmatprep.mubr.msk.f32.mxu1 %vm80_vm1, %v782_v15  ;;  %v785_v0 = vld [vmem:[%s4661_s1 + $0x18] sm:$0xff] }
 0xb28   :  { %3586 = vmatprep.subr.bf16.mxu1 %v3585_v2 }
 0xb2b   :  { %3588 = vmatpush3.bf16.msra.mxu1 %v3585_v2 }
 0xb2c   :  { %3590 = vmatprep.subr.bf16.mxu1 %v3589_v7 }
 0xb2f   :  { %3592 = vmatpush3.bf16.msra.mxu1 %v3589_v7 }
 0xb30   :  { %3594 = vmatprep.subr.bf16.mxu1 %v3593_v11 }
 0xb33   :  { %3596 = vmatpush3.bf16.msra.mxu1 %v3593_v11 }
 0xb34   :  { %3615 = vmatprep.subr.bf16.mxu1 %v3836_v3 }
 0xb36   :  { %3281 = vmatmul.mubr.msk.f32.vlgmr.msra.gmra.mrb[8].mxu1 %vm80_vm1, %v783_v16 }
 0xb37   :  { %3617 = vmatpush3.bf16.msra.mxu1 %v4126_v18  ;;  %3283 = vmatprep.mubr.msk.f32.mxu1 %vm80_vm1, %v784_v63 }
 0xb38   :  { %3618 = vmatprep.subr.bf16.mxu1 %v3836_v3 }
 0xb3a   :  { %3284 = vmatmul.mubr.msk.f32.gmra.mrb[10].mxu1 %vm80_vm1, %v785_v0 }
 0xb3b   :  { %3620 = vmatpush3.bf16.msra.mxu1 %v4138_v21 }
 0xb3c   :  { %3627 = vmatprep.subr.bf16.mxu1 %v3836_v3 }
 0xbf9   :  { %v660_v50 = vpop.f32.mrb[6].mxu1 }
 0xbfa   :  { %v661_v51 = vadd.f32 %v660_v50, %v186_v49  ;;  %v3252_v52 = vpop.f32.mrb[7].mxu1 }
 0xbfc   :  { %3750 = vtanh.f32 %v661_v51 }
 0xc06   :  { %v3751_v53 = vpop.eup %3750 }
 0xc07   :  { %v665_v54 = vmul.f32 %v3751_v53, %v4003_v34 }
 0xc09   :  { %v666_v55 = vadd.f32 %v665_v54, %v4005_v35  ;;  %v3282_v27 = vpop.f32.mrb[8].mxu1 }
 0xc0a   :  { %v899_v28 = vpop.f32.mrb[9].mxu1  ;;  %v905_v50 = vadd.f32 %v3282_v27, %v4169_v36 }
 0xc0b   :  { %669 = vrot.lane.b32.xlu0 %v666_v55, %s3839_s5  ;;  %v667_v58 = vmul.f32 %v666_v55, %v581_v43  ;;  %v900_v37 = vadd.f32 %v4169_v36, %v899_v28 }
 0xc0d   :  { %v3285_v8 = vpop.f32.mrb[10].mxu1 }
 0xc0e   :  { %v909_v9 = vpop.f32.mrb[11].mxu1 }
 0xc0f   :  { %v910_v11 = vadd.f32 %v4169_v36, %v909_v9 }
 0xc7d   :  { %v670_v56 = vpop.permute.xlu0 %669 }
 0xc7e   :  { %v672_v57 = vmul.f32 %v670_v56, %v666_v55 }
 0xc80   :  { %674 = vrot.lane.b32.xlu1 %v672_v57, %s3840_s24 }
 0xcf2   :  { %v675_v59 = vpop.permute.xlu1 %674 }
 0xcf3   :  { %v4085_v60 = vadd.f32 %v675_v59, %v667_v58 }
 0xcf5   :  { %3752 = vtanh.f32 %v4085_v60 }
 0xcff   :  { %v3753_v10 = vpop.eup %3752 }
 0xd00   :  { %680 = vrot.lane.b32.xlu0 %v3753_v10, %s3839_s5 }
 0xd72   :  { %v681_v22 = vpop.permute.xlu0 %680 }
 0xd73   :  { %v4142_v23 = vmul.f32 %v681_v22, %v666_v55 }
 0xd75   :  { %v684_v25 = vmax.f32 %v4076_v47, %v4142_v23  ;;  %686 = vrot.lane.b32.xlu1 %v4142_v23, %s3840_s24  ;;  %v2663_v47 = vld [vmem:[%s4667_s14 + $0x58] sm:$0xff] }
 0xde7   :  { %v687_v26 = vpop.permute.xlu1 %686 }
 0xde8   :  { %3262 = vmatmul.mubr.msk.f32.vlgmr.msra.gmra.mrb[8].mxu0 %vm194_vm2, %v687_v26 }
 0xde9   :  { %3599 = vmatpush3.bf16.msra.mxu0 %v4126_v18  ;;  %3300 = vmatprep.mubr.msk.f32.mxu0 %vm3837_vm0, %v3838_v4 }
 0xdea   :  { %3600 = vmatprep.subr.bf16.mxu0 %v3836_v3 }
 0xded   :  { %3602 = vmatpush3.bf16.msra.mxu0 %v4138_v21 }
 0xdee   :  { %3603 = vmatprep.subr.bf16.mxu0 %v3836_v3 }
 0xdf0   :  { %3301 = vmatmul.mubr.f32.vlgmr.msra.gmra.mrb[10].mxu0 %v3838_v4 }
 0xdf1   :  { %3605 = vmatpush3.bf16.msra.mxu0 %v4126_v18  ;;  %3311 = vmatprep.mubr.msk.f32.mxu0 %vm3837_vm0, %v3838_v4 }
 0xdf2   :  { %3606 = vmatprep.subr.bf16.mxu0 %v3836_v3 }
 0xdf5   :  { %3608 = vmatpush3.bf16.msra.mxu0 %v4138_v21 }
 0xdf6   :  { %3609 = vmatprep.subr.bf16.mxu0 %v3836_v3 }
 0xebb   :  { %v756_v31 = vpop.f32.mrb[8].mxu0 }
 0xebc   :  { %v4164_v32 = vadd.f32 %v756_v31, %v191_v30  ;;  %v3263_v33 = vpop.f32.mrb[9].mxu0  ;;  %v786_v31 = vld [vmem:[%s4661_s1 + $0x20] sm:$0xff] }
 0xebd   :  { %v787_v33 = vld [vmem:[%s4661_s1 + $0x28] sm:$0xff]  ;;  %3286 = vmatprep.mubr.msk.f32.mxu1 %vm80_vm1, %v786_v31 }
 0xebe   :  { %3287 = vmatmul.mubr.msk.f32.gmra.mrb[12].mxu1 %vm80_vm1, %v787_v33 }
 0xec3   :  { %v1004_v38 = vpop.f32.mrb[10].mxu0 }
 0xec4   :  { %v1005_v39 = vadd.f32 %v1004_v38, %v900_v37  ;;  %v3302_v12 = vpop.f32.mrb[11].mxu0  ;;  %v788_v37 = vld [vmem:[%s4661_s1 + $0x30] sm:$0xff]  ;;  %v789_v38 = vld [vmem:[%s4661_s1 + $0x38] sm:$0xff] }
 0xec5   :  { %3289 = vmatprep.mubr.msk.f32.mxu1 %vm80_vm1, %v788_v37 }
 0xec6   :  { %3754 = vtanh.f32 %v1005_v39  ;;  %3290 = vmatmul.mubr.msk.f32.gmra.mrb[14].mxu1 %vm80_vm1, %v789_v38 }
 0xec7   :  { %3333 = vmatprep.mubr.msk.f32.mxu1 %vm3837_vm0, %v3838_v4 }
 0xed0   :  { %v3755_v40 = vpop.eup %3754 }
 0xed1   :  { %v1009_v41 = vmul.f32 %v3755_v40, %v4003_v34 }
 0xed3   :  { %v1010_v24 = vadd.f32 %v1009_v41, %v4005_v35 }
 0xed5   :  { %1013 = vrot.lane.b32.xlu0 %v1010_v24, %s3839_s5  ;;  %v1011_v42 = vmul.f32 0.0, %v1010_v24 }
 0xf47   :  { %v1014_v29 = vpop.permute.xlu0 %1013 }
 0xf48   :  { %v1016_v17 = vmul.f32 %v1014_v29, %v1010_v24 }
 0xf4a   :  { %1018 = vrot.lane.b32.xlu1 %v1016_v17, %s3840_s24 }
 0xfbc   :  { %v1019_v43 = vpop.permute.xlu1 %1018 }
 0xfbd   :  { %v1021_v44 = vadd.f32 %v1019_v43, %v1011_v42 }
 0xfbf   :  { %3756 = vtanh.f32 %v1021_v44 }
 0xfc9   :  { %v3757_v45 = vpop.eup %3756 }
 0xfca   :  { %1024 = vrot.lane.b32.xlu0 %v3757_v45, %s3839_s5 }
0x103c   :  { %v1025_v46 = vpop.permute.xlu0 %1024 }
0x103d   :  { %v1027_v48 = vmul.f32 %v1025_v46, %v1010_v24  ;;  %v4235_v24 = vpop.f32.mrb[12].mxu1 }
0x103e   :  { %v919_v29 = vpop.f32.mrb[13].mxu1 }
0x103f   :  { %1030 = vrot.lane.b32.xlu1 %v1027_v48, %s3840_s24  ;;  %v1028_v5 = vmax.f32 %v1027_v48, -1e+30  ;;  %v4237_v17 = vpop.f32.mrb[14].mxu1  ;;  %v920_v63 = vadd.f32 %v4169_v36, %v919_v29 }
0x1040   :  { %v4239_v42 = vpop.f32.mrb[15].mxu1 }
0x10b1   :  { %v1031_v49 = vpop.permute.xlu1 %1030 }
0x10b2   :  { %3312 = vmatmul.mubr.msk.f32.vlgmr.msra.gmra.mrb[12].mxu0 %vm194_vm2, %v1031_v49 }
0x10b3   :  { %3611 = vmatpush3.bf16.msra.mxu0 %v4126_v18  ;;  %3322 = vmatprep.mubr.msk.f32.mxu0 %vm3837_vm0, %v3838_v4 }
0x10b4   :  { %3612 = vmatprep.subr.bf16.mxu0 %v3836_v3 }
0x10b7   :  { %3614 = vmatpush3.bf16.msra.mxu0 %v4138_v21 }
0x10b8   :  { %3621 = vmatprep.subr.bf16.mxu0 %v3836_v3 }
0x1185   :  { %v1100_v51 = vpop.f32.mrb[12].mxu0 }
0x1186   :  { %v1101_v52 = vadd.f32 %v1100_v51, %v905_v50  ;;  %v3313_v53 = vpop.f32.mrb[13].mxu0 }
0x1188   :  { %3758 = vtanh.f32 %v1101_v52 }
0x1192   :  { %v3759_v54 = vpop.eup %3758 }
0x1193   :  { %v1105_v55 = vmul.f32 %v3759_v54, %v4003_v34 }
0x1195   :  { %v1106_v56 = vadd.f32 %v1105_v55, %v4005_v35 }
0x1197   :  { %1109 = vrot.lane.b32.xlu0 %v1106_v56, %s3839_s5  ;;  %v1107_v59 = vmul.f32 %v1106_v56, %v1021_v44  ;;  %v915_v44 = vadd.f32 %v3285_v8, %v4169_v36 }
0x1209   :  { %v1110_v57 = vpop.permute.xlu0 %1109 }
0x120a   :  { %v1112_v58 = vmul.f32 %v1110_v57, %v1106_v56 }
0x120c   :  { %1114 = vrot.lane.b32.xlu1 %v1112_v58, %s3840_s24 }
0x127e   :  { %v1115_v61 = vpop.permute.xlu1 %1114 }
0x127f   :  { %v1117_v62 = vadd.f32 %v1115_v61, %v1107_v59 }
0x1281   :  { %3760 = vtanh.f32 %v1117_v62 }
0x128b   :  { %v3761_v1 = vpop.eup %3760 }
0x128c   :  { %1120 = vrot.lane.b32.xlu0 %v3761_v1, %s3839_s5 }
0x12fe   :  { %v1121_v2 = vpop.permute.xlu0 %1120 }
0x12ff   :  { %v1123_v6 = vmul.f32 %v1121_v2, %v1106_v56 }
0x1301   :  { %v4199_v7 = vmax.f32 %v1028_v5, %v1123_v6  ;;  %1126 = vrot.lane.b32.xlu1 %v1123_v6, %s3840_s24 }
0x1373   :  { %v1127_v10 = vpop.permute.xlu1 %1126 }
0x1374   :  { %3323 = vmatmul.mubr.msk.f32.vlgmr.msra.gmra.mrb[14].mxu0 %vm194_vm2, %v1127_v10 }
0x1375   :  { %3623 = vmatpush3.bf16.msra.mxu0 %v4126_v18  ;;  %3344 = vmatprep.mubr.msk.f32.mxu0 %vm3837_vm0, %v3838_v4 }
0x1376   :  { %3624 = vmatprep.subr.bf16.mxu0 %v3836_v3 }
0x1379   :  { %3626 = vmatpush3.bf16.msra.mxu0 %v4138_v21 }
0x137a   :  { %3633 = vmatprep.subr.bf16.mxu0 %v3836_v3 }
0x1447   :  { %v1196_v13 = vpop.f32.mrb[14].mxu0 }
0x1448   :  { %v1197_v14 = vadd.f32 %v1196_v13, %v910_v11  ;;  %v3324_v15 = vpop.f32.mrb[15].mxu0 }
0x144a   :  { %3762 = vtanh.f32 %v1197_v14 }
0x1454   :  { %v3763_v16 = vpop.eup %3762 }
0x1455   :  { %v1201_v19 = vmul.f32 %v3763_v16, %v4003_v34 }
0x1457   :  { %v1202_v20 = vadd.f32 %v1201_v19, %v4005_v35 }
0x1459   :  { %1205 = vrot.lane.b32.xlu0 %v1202_v20, %s3839_s5  ;;  %v1203_v27 = vmul.f32 %v1202_v20, %v1117_v62 }
0x14cb   :  { %v1206_v22 = vpop.permute.xlu0 %1205 }
0x14cc   :  { %v1208_v26 = vmul.f32 %v1206_v22, %v1202_v20  ;;  %v925_v22 = vadd.f32 %v4235_v24, %v4169_v36 }
0x14ce   :  { %1210 = vrot.lane.b32.xlu1 %v1208_v26, %s3840_s24 }
0x1540   :  { %v1211_v28 = vpop.permute.xlu1 %1210 }
0x1541   :  { %v1213_v30 = vadd.f32 %v1211_v28, %v1203_v27 }
0x1543   :  { %3764 = vtanh.f32 %v1213_v30 }
0x154d   :  { %v3765_v39 = vpop.eup %3764 }
0x154e   :  { %1216 = vrot.lane.b32.xlu0 %v3765_v39, %s3839_s5 }
0x15c0   :  { %v1217_v12 = vpop.permute.xlu0 %1216 }
0x15c1   :  { %v1219_v40 = vmul.f32 %v1217_v12, %v1202_v20 }
0x15c3   :  { %v1220_v41 = vmax.f32 %v4199_v7, %v1219_v40  ;;  %1222 = vrot.lane.b32.xlu1 %v1219_v40, %s3840_s24 }
0x1635   :  { %v1223_v43 = vpop.permute.xlu1 %1222 }
0x1636   :  { %3334 = vmatmul.mubr.msk.f32.vlgmr.msra.gmra.mrb[16].mxu1 %vm194_vm2, %v1223_v43  ;;  %v930_v43 = vadd.f32 %v4169_v36, %v4239_v42  ;;  %v1710_v42 = vld [vmem:[%s4663_s9] sm:$0xff] }
0x1637   :  { %3629 = vmatpush3.bf16.msra.mxu1 %v4126_v18  ;;  %3355 = vmatprep.mubr.msk.f32.mxu1 %vm3837_vm0, %v3838_v4 }
0x1638   :  { %3630 = vmatprep.subr.bf16.mxu1 %v3836_v3 }
0x163b   :  { %3632 = vmatpush3.bf16.msra.mxu1 %v4138_v21 }
0x163c   :  { %3639 = vmatprep.subr.bf16.mxu1 %v3836_v3 }
0x1709   :  { %v1292_v45 = vpop.f32.mrb[16].mxu1 }
0x170a   :  { %v1293_v46 = vadd.f32 %v1292_v45, %v915_v44  ;;  %v3335_v48 = vpop.f32.mrb[17].mxu1 }
0x170c   :  { %3766 = vtanh.f32 %v1293_v46 }
0x1716   :  { %v3767_v49 = vpop.eup %3766 }
0x1717   :  { %v1297_v50 = vmul.f32 %v3767_v49, %v4003_v34 }
0x1719   :  { %v1298_v51 = vadd.f32 %v1297_v50, %v4005_v35 }
0x171b   :  { %1301 = vrot.lane.b32.xlu0 %v1298_v51, %s3839_s5  ;;  %v1299_v54 = vmul.f32 %v1298_v51, %v1213_v30 }
0x178d   :  { %v1302_v52 = vpop.permute.xlu0 %1301 }
0x178e   :  { %v1304_v53 = vmul.f32 %v1302_v52, %v1298_v51 }
0x1790   :  { %1306 = vrot.lane.b32.xlu1 %v1304_v53, %s3840_s24 }
0x1802   :  { %v1307_v55 = vpop.permute.xlu1 %1306 }
0x1803   :  { %v1309_v56 = vadd.f32 %v1307_v55, %v1299_v54 }
0x1805   :  { %3768 = vtanh.f32 %v1309_v56 }
0x180f   :  { %v3769_v57 = vpop.eup %3768 }
0x1810   :  { %1312 = vrot.lane.b32.xlu0 %v3769_v57, %s3839_s5  ;;  %v1712_v57 = vld [vmem:[%s4663_s9 + $0x10] sm:$0xff] }
0x1882   :  { %v1313_v58 = vpop.permute.xlu0 %1312 }
0x1883   :  { %v1315_v59 = vmul.f32 %v1313_v58, %v1298_v51 }
0x1885   :  { %v1316_v61 = vmax.f32 %v1220_v41, %v1315_v59  ;;  %1318 = vrot.lane.b32.xlu1 %v1315_v59, %s3840_s24  ;;  %v1713_v59 = vld [vmem:[%s4663_s9 + $0x18] sm:$0xff] }
0x18f7   :  { %v1319_v62 = vpop.permute.xlu1 %1318 }
0x18f8   :  { %3345 = vmatmul.mubr.msk.f32.vlgmr.msra.gmra.mrb[16].mxu0 %vm194_vm2, %v1319_v62  ;;  %v1714_v62 = vld [vmem:[%s4663_s9 + $0x20] sm:$0xff] }
0x18f9   :  { %3635 = vmatpush3.bf16.msra.mxu0 %v4126_v18  ;;  %3366 = vmatprep.mubr.msk.f32.mxu0 %vm3837_vm0, %v3838_v4 }
0x18fa   :  { %3636 = vmatprep.subr.bf16.mxu0 %v3836_v3 }
0x18fd   :  { %3638 = vmatpush3.bf16.msra.mxu0 %v4138_v21 }
0x19cb   :  { %v1388_v0 = vpop.f32.mrb[16].mxu0 }
0x19cc   :  { %v1389_v1 = vadd.f32 %v1388_v0, %v920_v63  ;;  %v3346_v2 = vpop.f32.mrb[17].mxu0  ;;  %v1715_v63 = vld [vmem:[%s4663_s9 + $0x28] sm:$0xff] }
0x19cd   :  { %v3653_v0 = vpack.c.bf16 %v1715_v63, %v1714_v62  ;;  %v1717_v2 = vld [vmem:[%s4663_s9 + $0x38] sm:$0xff]  ;;  %v1704_v63 = vld [vmem:[%s4665_s2 + $0x10] sm:$0xff] }
0x19ce   :  { %3770 = vtanh.f32 %v1389_v1  ;;  %v1716_v1 = vld [vmem:[%s4663_s9 + $0x30] sm:$0xff] }
0x19d8   :  { %v3771_v5 = vpop.eup %3770 }
0x19d9   :  { %v1393_v6 = vmul.f32 %v3771_v5, %v4003_v34 }
0x19db   :  { %v1394_v7 = vadd.f32 %v1393_v6, %v4005_v35  ;;  %v3657_v6 = vpack.c.bf16 %v1717_v2, %v1716_v1 }
0x19dd   :  { %1397 = vrot.lane.b32.xlu0 %v1394_v7, %s3839_s5  ;;  %v1395_v10 = vmul.f32 %v1394_v7, %v1309_v56  ;;  %v1711_v56 = vld [vmem:[%s4663_s9 + $0x8] sm:$0xff] }
0x19de   :  { %v3645_v58 = vpack.c.bf16 %v1711_v56, %v1710_v42 }
0x19e0   :  { %3646 = vmatprep.subr.bf16.mxu0 %v3645_v58 }
0x1a4f   :  { %v1398_v8 = vpop.permute.xlu0 %1397 }
0x1a50   :  { %v1400_v9 = vmul.f32 %v1398_v8, %v1394_v7  ;;  %v1719_v8 = vld [vmem:[%s4664_s10 + $0x8] sm:$0xff] }
0x1a52   :  { %1402 = vrot.lane.b32.xlu1 %v1400_v9, %s3840_s24  ;;  %v1702_v9 = vld [vmem:[%s4665_s2] sm:$0xff] }
0x1ac4   :  { %v1403_v11 = vpop.permute.xlu1 %1402 }
0x1ac5   :  { %v1405_v13 = vadd.f32 %v1403_v11, %v1395_v10  ;;  %v1703_v10 = vld [vmem:[%s4665_s2 + $0x8] sm:$0xff] }
0x1ac7   :  { %3772 = vtanh.f32 %v1405_v13 }
0x1ad1   :  { %v3773_v14 = vpop.eup %3772 }
0x1ad2   :  { %1408 = vrot.lane.b32.xlu0 %v3773_v14, %s3839_s5  ;;  %v1721_v14 = vld [vmem:[%s4664_s10 + $0x18] sm:$0xff] }
0x1b44   :  { %v1409_v15 = vpop.permute.xlu0 %1408 }
0x1b45   :  { %v1411_v16 = vmul.f32 %v1409_v15, %v1394_v7  ;;  %v1718_v7 = vld [vmem:[%s4664_s10] sm:$0xff] }
0x1b46   :  { %v4333_v11 = vpack.c.bf16 %v1719_v8, %v1718_v7 }
0x1b47   :  { %v1412_v19 = vmax.f32 %v1316_v61, %v1411_v16  ;;  %1414 = vrot.lane.b32.xlu1 %v1411_v16, %s3840_s24  ;;  %v3649_v61 = vpack.c.bf16 %v1713_v59, %v1712_v57 }
0x1bb9   :  { %v1415_v20 = vpop.permute.xlu1 %1414 }
0x1bba   :  { %3356 = vmatmul.mubr.msk.f32.vlgmr.msra.gmra.mrb[18].mxu1 %vm194_vm2, %v1415_v20 }
0x1bbb   :  { %3641 = vmatpush3.bf16.msra.mxu1 %v4126_v18  ;;  %3377 = vmatprep.mubr.msk.f32.mxu1 %vm3837_vm0, %v3838_v4 }
0x1bbc   :  { %3642 = vmatprep.subr.bf16.mxu1 %v3836_v3 }
0x1bbf   :  { %3644 = vmatpush3.bf16.msra.mxu1 %v4138_v21 }
0x1bc0   :  { %3661 = vmatprep.subr.bf16.mxu1 %v3836_v3 }
0x1c8d   :  { %v1484_v26 = vpop.f32.mrb[18].mxu1 }
0x1c8e   :  { %v1485_v27 = vadd.f32 %v1484_v26, %v925_v22  ;;  %v3357_v28 = vpop.f32.mrb[19].mxu1 }
0x1c8f   :  { %v935_v28 = vadd.f32 %v4237_v17, %v4169_v36 }
0x1c90   :  { %3774 = vtanh.f32 %v1485_v27 }
0x1c9a   :  { %v3775_v30 = vpop.eup %3774 }
0x1c9b   :  { %v1489_v31 = vmul.f32 %v3775_v30, %v4003_v34 }
0x1c9d   :  { %v1490_v18 = vadd.f32 %v1489_v31, %v4005_v35 }
0x1c9f   :  { %1493 = vrot.lane.b32.xlu0 %v1490_v18, %s3839_s5  ;;  %v1491_v21 = vmul.f32 %v1490_v18, %v1405_v13  ;;  %v1720_v13 = vld [vmem:[%s4664_s10 + $0x10] sm:$0xff] }
0x1ca0   :  { %v4345_v15 = vpack.c.bf16 %v1721_v14, %v1720_v13 }
0x1d11   :  { %v1494_v33 = vpop.permute.xlu0 %1493 }
0x1d12   :  { %v1496_v37 = vmul.f32 %v1494_v33, %v1490_v18  ;;  %v4376_v33 = vld [vmem:[%s4666_s11] ss:$0 sm:$0xff] }
0x1d14   :  { %1498 = vrot.lane.b32.xlu1 %v1496_v37, %s3840_s24 }
0x1d86   :  { %v1499_v38 = vpop.permute.xlu1 %1498 }
0x1d87   :  { %v1501_v39 = vadd.f32 %v1499_v38, %v1491_v21 }
0x1d89   :  { %3776 = vtanh.f32 %v1501_v39 }
0x1d93   :  { %v3777_v12 = vpop.eup %3776 }
0x1d94   :  { %1504 = vrot.lane.b32.xlu0 %v3777_v12, %s3839_s5 }
0x1e06   :  { %v1505_v40 = vpop.permute.xlu0 %1504 }
0x1e07   :  { %v1507_v41 = vmul.f32 %v1505_v40, %v1490_v18 }
0x1e09   :  { %v4282_v24 = vmax.f32 %v1412_v19, %v1507_v41  ;;  %1510 = vrot.lane.b32.xlu1 %v1507_v41, %s3840_s24 }
0x1e7b   :  { %v1511_v29 = vpop.permute.xlu1 %1510 }
0x1e7c   :  { %3367 = vmatmul.mubr.msk.f32.vlgmr.msra.gmra.mrb[18].mxu0 %vm194_vm2, %v1511_v29 }
0x1e7d   :  { %3648 = vmatpush3.bf16.msra.mxu0 %v3645_v58  ;;  %3396 = vmatprep.mubr.msk.f32.mxu0 %vm80_vm1, %v1702_v9 }
0x1e7e   :  { %3650 = vmatprep.subr.bf16.mxu0 %v3649_v61 }
0x1e81   :  { %3652 = vmatpush3.bf16.msra.mxu0 %v3649_v61 }
0x1e82   :  { %3654 = vmatprep.subr.bf16.mxu0 %v3653_v0 }
0x1e85   :  { %3656 = vmatpush3.bf16.msra.mxu0 %v3653_v0  ;;  %v1705_v0 = vld [vmem:[%s4665_s2 + $0x18] sm:$0xff] }
0x1e86   :  { %3658 = vmatprep.subr.bf16.mxu0 %v3657_v6 }
0x1e89   :  { %3660 = vmatpush3.bf16.msra.mxu0 %v3657_v6 }
0x1e8a   :  { %3679 = vmatprep.subr.bf16.mxu0 %v3836_v3 }
0x1e8c   :  { %3397 = vmatmul.mubr.msk.f32.vlgmr.msra.gmra.mrb[20].mxu0 %vm80_vm1, %v1703_v10 }
0x1e8d   :  { %3681 = vmatpush3.bf16.msra.mxu0 %v4333_v11  ;;  %3399 = vmatprep.mubr.msk.f32.mxu0 %vm80_vm1, %v1704_v63 }
0x1e8e   :  { %3682 = vmatprep.subr.bf16.mxu0 %v3836_v3 }
0x1e90   :  { %3400 = vmatmul.mubr.msk.f32.gmra.mrb[22].mxu0 %vm80_vm1, %v1705_v0 }
0x1e91   :  { %3684 = vmatpush3.bf16.msra.mxu0 %v4345_v15 }
0x1e92   :  { %3691 = vmatprep.subr.bf16.mxu0 %v3836_v3 }
0x1f4f   :  { %v1580_v44 = vpop.f32.mrb[18].mxu0 }
0x1f50   :  { %v1581_v45 = vadd.f32 %v1580_v44, %v930_v43  ;;  %v3368_v46 = vpop.f32.mrb[19].mxu0 }
0x1f52   :  { %3778 = vtanh.f32 %v1581_v45 }
0x1f5c   :  { %v3779_v48 = vpop.eup %3778 }
0x1f5d   :  { %v1585_v49 = vmul.f32 %v3779_v48, %v4003_v34 }
0x1f5f   :  { %v1586_v50 = vadd.f32 %v1585_v49, %v4005_v35  ;;  %v3398_v26 = vpop.f32.mrb[20].mxu0 }
0x1f60   :  { %v1819_v27 = vpop.f32.mrb[21].mxu0 }
0x1f61   :  { %1589 = vrot.lane.b32.xlu0 %v1586_v50, %s3839_s5  ;;  %v1587_v53 = vmul.f32 %v1586_v50, %v1501_v39  ;;  %v1820_v37 = vadd.f32 %v4376_v33, %v1819_v27 }
0x1f63   :  { %v3401_v8 = vpop.f32.mrb[22].mxu0 }
0x1f64   :  { %v1829_v9 = vpop.f32.mrb[23].mxu0 }
0x1f65   :  { %v1830_v13 = vadd.f32 %v4376_v33, %v1829_v9 }
0x1fd3   :  { %v1590_v51 = vpop.permute.xlu0 %1589 }
0x1fd4   :  { %v1592_v52 = vmul.f32 %v1590_v51, %v1586_v50 }
0x1fd6   :  { %1594 = vrot.lane.b32.xlu1 %v1592_v52, %s3840_s24 }
0x2048   :  { %v1595_v54 = vpop.permute.xlu1 %1594 }
0x2049   :  { %v4292_v55 = vadd.f32 %v1595_v54, %v1587_v53 }
0x204b   :  { %3780 = vtanh.f32 %v4292_v55 }
0x2055   :  { %v3781_v5 = vpop.eup %3780 }
0x2056   :  { %1600 = vrot.lane.b32.xlu0 %v3781_v5, %s3839_s5 }
0x20c8   :  { %v1601_v16 = vpop.permute.xlu0 %1600 }
0x20c9   :  { %v4349_v19 = vmul.f32 %v1601_v16, %v1586_v50  ;;  %v1825_v50 = vadd.f32 %v3398_v26, %v4376_v33 }
0x20cb   :  { %v1604_v20 = vmax.f32 %v4282_v24, %v4349_v19  ;;  %1606 = vrot.lane.b32.xlu1 %v4349_v19, %s3840_s24  ;;  %v2653_v24 = vld [vmem:[%s4667_s14 + $0x8] sm:$0xff] }
0x213d   :  { %v1607_v22 = vpop.permute.xlu1 %1606 }
0x213e   :  { %3378 = vmatmul.mubr.msk.f32.vlgmr.msra.gmra.mrb[20].mxu1 %vm194_vm2, %v1607_v22 }
0x213f   :  { %3663 = vmatpush3.bf16.msra.mxu1 %v4333_v11  ;;  %3416 = vmatprep.mubr.msk.f32.mxu1 %vm3837_vm0, %v3838_v4 }
0x2140   :  { %3664 = vmatprep.subr.bf16.mxu1 %v3836_v3 }
0x2143   :  { %3666 = vmatpush3.bf16.msra.mxu1 %v4345_v15 }
0x2144   :  { %3667 = vmatprep.subr.bf16.mxu1 %v3836_v3 }
0x2146   :  { %3417 = vmatmul.mubr.f32.vlgmr.msra.gmra.mrb[22].mxu1 %v3838_v4 }
0x2147   :  { %3669 = vmatpush3.bf16.msra.mxu1 %v4333_v11  ;;  %3427 = vmatprep.mubr.msk.f32.mxu1 %vm3837_vm0, %v3838_v4 }
0x2148   :  { %3670 = vmatprep.subr.bf16.mxu1 %v3836_v3 }
0x214b   :  { %3672 = vmatpush3.bf16.msra.mxu1 %v4345_v15 }
0x214c   :  { %3673 = vmatprep.subr.bf16.mxu1 %v3836_v3 }
0x2211   :  { %v1676_v30 = vpop.f32.mrb[20].mxu1 }
0x2212   :  { %v4371_v31 = vadd.f32 %v1676_v30, %v935_v28  ;;  %v3379_v18 = vpop.f32.mrb[21].mxu1 }
0x2219   :  { %v1924_v21 = vpop.f32.mrb[22].mxu1 }
0x221a   :  { %v1925_v38 = vadd.f32 %v1924_v21, %v1820_v37  ;;  %v3418_v39 = vpop.f32.mrb[23].mxu1 }
0x221b   :  { %v1706_v39 = vld [vmem:[%s4665_s2 + $0x20] sm:$0xff] }
0x221c   :  { %3782 = vtanh.f32 %v1925_v38  ;;  %3402 = vmatprep.mubr.msk.f32.mxu0 %vm80_vm1, %v1706_v39 }
0x2226   :  { %v3783_v12 = vpop.eup %3782 }
0x2227   :  { %v1929_v40 = vmul.f32 %v3783_v12, %v4003_v34  ;;  %v1707_v12 = vld [vmem:[%s4665_s2 + $0x28] sm:$0xff] }
0x2228   :  { %3403 = vmatmul.mubr.msk.f32.gmra.mrb[24].mxu0 %vm80_vm1, %v1707_v12 }
0x2229   :  { %v1930_v36 = vadd.f32 %v1929_v40, %v4005_v35  ;;  %v1708_v40 = vld [vmem:[%s4665_s2 + $0x30] sm:$0xff] }
0x222a   :  { %3405 = vmatprep.mubr.msk.f32.mxu0 %vm80_vm1, %v1708_v40 }
0x222b   :  { %1933 = vrot.lane.b32.xlu0 %v1930_v36, %s3839_s5  ;;  %v1931_v29 = vmul.f32 0.0, %v1930_v36 }
0x229d   :  { %v1934_v17 = vpop.permute.xlu0 %1933 }
0x229e   :  { %v1936_v41 = vmul.f32 %v1934_v17, %v1930_v36 }
0x22a0   :  { %1938 = vrot.lane.b32.xlu1 %v1936_v41, %s3840_s24 }
0x2312   :  { %v1939_v43 = vpop.permute.xlu1 %1938 }
0x2313   :  { %v1941_v44 = vadd.f32 %v1939_v43, %v1931_v29 }
0x2315   :  { %3784 = vtanh.f32 %v1941_v44 }
0x231f   :  { %v3785_v45 = vpop.eup %3784 }
0x2320   :  { %1944 = vrot.lane.b32.xlu0 %v3785_v45, %s3839_s5 }
0x2392   :  { %v1945_v46 = vpop.permute.xlu0 %1944 }
0x2393   :  { %v1947_v48 = vmul.f32 %v1945_v46, %v1930_v36  ;;  %v1709_v36 = vld [vmem:[%s4665_s2 + $0x38] sm:$0xff] }
0x2394   :  { %3406 = vmatmul.mubr.msk.f32.gmra.mrb[26].mxu0 %vm80_vm1, %v1709_v36 }
0x2395   :  { %1950 = vrot.lane.b32.xlu1 %v1947_v48, %s3840_s24  ;;  %v1948_v5 = vmax.f32 %v1947_v48, -1e+30  ;;  %3449 = vmatprep.mubr.msk.f32.mxu0 %vm3837_vm0, %v3838_v4 }
0x2407   :  { %v1951_v49 = vpop.permute.xlu1 %1950 }
0x2408   :  { %3428 = vmatmul.mubr.msk.f32.vlgmr.msra.gmra.mrb[24].mxu1 %vm194_vm2, %v1951_v49 }
0x2409   :  { %3675 = vmatpush3.bf16.msra.mxu1 %v4333_v11  ;;  %3438 = vmatprep.mubr.msk.f32.mxu1 %vm3837_vm0, %v3838_v4 }
0x240a   :  { %3676 = vmatprep.subr.bf16.mxu1 %v3836_v3 }
0x240d   :  { %3678 = vmatpush3.bf16.msra.mxu1 %v4345_v15 }
0x240e   :  { %3685 = vmatprep.subr.bf16.mxu1 %v3836_v3 }
0x24db   :  { %v2020_v51 = vpop.f32.mrb[24].mxu1 }
0x24dc   :  { %v2021_v52 = vadd.f32 %v2020_v51, %v1825_v50  ;;  %v3429_v53 = vpop.f32.mrb[25].mxu1  ;;  %v1835_v50 = vadd.f32 %v3401_v8, %v4376_v33 }
0x24de   :  { %3786 = vtanh.f32 %v2021_v52 }
0x24e8   :  { %v3787_v54 = vpop.eup %3786 }
0x24e9   :  { %v2025_v42 = vmul.f32 %v3787_v54, %v4003_v34 }
0x24eb   :  { %v2026_v56 = vadd.f32 %v2025_v42, %v4005_v35 }
0x24ed   :  { %2029 = vrot.lane.b32.xlu0 %v2026_v56, %s3839_s5  ;;  %v2027_v59 = vmul.f32 %v2026_v56, %v1941_v44  ;;  %v4442_v44 = vpop.f32.mrb[24].mxu0 }
0x24ee   :  { %v1839_v45 = vpop.f32.mrb[25].mxu0  ;;  %v1845_v39 = vadd.f32 %v4442_v44, %v4376_v33 }
0x24ef   :  { %v4444_v46 = vpop.f32.mrb[26].mxu0 }
0x24f0   :  { %v4446_v48 = vpop.f32.mrb[27].mxu0 }
0x255f   :  { %v2030_v57 = vpop.permute.xlu0 %2029 }
0x2560   :  { %v2032_v58 = vmul.f32 %v2030_v57, %v2026_v56 }
0x2562   :  { %2034 = vrot.lane.b32.xlu1 %v2032_v58, %s3840_s24 }
0x25d4   :  { %v2035_v61 = vpop.permute.xlu1 %2034 }
0x25d5   :  { %v2037_v62 = vadd.f32 %v2035_v61, %v2027_v59 }
0x25d7   :  { %3788 = vtanh.f32 %v2037_v62 }
0x25e1   :  { %v3789_v1 = vpop.eup %3788 }
0x25e2   :  { %2040 = vrot.lane.b32.xlu0 %v3789_v1, %s3839_s5 }
0x2654   :  { %v2041_v2 = vpop.permute.xlu0 %2040 }
0x2655   :  { %v2043_v6 = vmul.f32 %v2041_v2, %v2026_v56 }
0x2657   :  { %v4406_v7 = vmax.f32 %v1948_v5, %v2043_v6  ;;  %2046 = vrot.lane.b32.xlu1 %v2043_v6, %s3840_s24  ;;  %v1840_v6 = vadd.f32 %v4376_v33, %v1839_v45 }
0x26c9   :  { %v2047_v10 = vpop.permute.xlu1 %2046 }
0x26ca   :  { %3439 = vmatmul.mubr.msk.f32.vlgmr.msra.gmra.mrb[26].mxu1 %vm194_vm2, %v2047_v10 }
0x26cb   :  { %3687 = vmatpush3.bf16.msra.mxu1 %v4333_v11  ;;  %3460 = vmatprep.mubr.msk.f32.mxu1 %vm3837_vm0, %v3838_v4 }
0x26cc   :  { %3688 = vmatprep.subr.bf16.mxu1 %v3836_v3 }
0x26cf   :  { %3690 = vmatpush3.bf16.msra.mxu1 %v4345_v15 }
0x26d0   :  { %3697 = vmatprep.subr.bf16.mxu1 %v3836_v3 }
0x279d   :  { %v2116_v14 = vpop.f32.mrb[26].mxu1 }
0x279e   :  { %v2117_v16 = vadd.f32 %v2116_v14, %v1830_v13  ;;  %v3440_v22 = vpop.f32.mrb[27].mxu1 }
0x27a0   :  { %3790 = vtanh.f32 %v2117_v16 }
0x27aa   :  { %v3791_v26 = vpop.eup %3790 }
0x27ab   :  { %v2121_v27 = vmul.f32 %v3791_v26, %v4003_v34 }
0x27ad   :  { %v2122_v28 = vadd.f32 %v2121_v27, %v4005_v35 }
0x27af   :  { %2125 = vrot.lane.b32.xlu0 %v2122_v28, %s3839_s5  ;;  %v2123_v37 = vmul.f32 %v2122_v28, %v2037_v62 }
0x2821   :  { %v2126_v30 = vpop.permute.xlu0 %2125 }
0x2822   :  { %v2128_v18 = vmul.f32 %v2126_v30, %v2122_v28 }
0x2824   :  { %2130 = vrot.lane.b32.xlu1 %v2128_v18, %s3840_s24 }
0x2896   :  { %v2131_v21 = vpop.permute.xlu1 %2130 }
0x2897   :  { %v2133_v38 = vadd.f32 %v2131_v21, %v2123_v37 }
0x2899   :  { %3792 = vtanh.f32 %v2133_v38 }
0x28a3   :  { %v3793_v17 = vpop.eup %3792 }
0x28a4   :  { %2136 = vrot.lane.b32.xlu0 %v3793_v17, %s3839_s5 }
0x2916   :  { %v2137_v41 = vpop.permute.xlu0 %2136 }
0x2917   :  { %v2139_v29 = vmul.f32 %v2137_v41, %v2122_v28 }
0x2919   :  { %v2140_v43 = vmax.f32 %v4406_v7, %v2139_v29  ;;  %2142 = vrot.lane.b32.xlu1 %v2139_v29, %s3840_s24 }
0x298b   :  { %v2143_v49 = vpop.permute.xlu1 %2142 }
0x298c   :  { %3450 = vmatmul.mubr.msk.f32.vlgmr.msra.gmra.mrb[28].mxu0 %vm194_vm2, %v2143_v49 }
0x298d   :  { %3693 = vmatpush3.bf16.msra.mxu0 %v4333_v11  ;;  %3471 = vmatprep.mubr.msk.f32.mxu0 %vm3837_vm0, %v3838_v4 }
0x298e   :  { %3694 = vmatprep.subr.bf16.mxu0 %v3836_v3 }
0x2991   :  { %3696 = vmatpush3.bf16.msra.mxu0 %v4345_v15 }
0x2992   :  { %3703 = vmatprep.subr.bf16.mxu0 %v3836_v3 }
0x2a5f   :  { %v2212_v51 = vpop.f32.mrb[28].mxu0 }
0x2a60   :  { %v2213_v52 = vadd.f32 %v2212_v51, %v1835_v50  ;;  %v3451_v53 = vpop.f32.mrb[29].mxu0 }
0x2a62   :  { %3794 = vtanh.f32 %v2213_v52 }
0x2a6c   :  { %v3795_v54 = vpop.eup %3794 }
0x2a6d   :  { %v2217_v42 = vmul.f32 %v3795_v54, %v4003_v34  ;;  %v1850_v54 = vadd.f32 %v4376_v33, %v4446_v48 }
0x2a6f   :  { %v2218_v56 = vadd.f32 %v2217_v42, %v4005_v35 }
0x2a71   :  { %2221 = vrot.lane.b32.xlu0 %v2218_v56, %s3839_s5  ;;  %v2219_v59 = vmul.f32 %v2218_v56, %v2133_v38 }
0x2ae3   :  { %v2222_v57 = vpop.permute.xlu0 %2221 }
0x2ae4   :  { %v2224_v58 = vmul.f32 %v2222_v57, %v2218_v56 }
0x2ae6   :  { %2226 = vrot.lane.b32.xlu1 %v2224_v58, %s3840_s24 }
0x2b58   :  { %v2227_v61 = vpop.permute.xlu1 %2226 }
0x2b59   :  { %v2229_v62 = vadd.f32 %v2227_v61, %v2219_v59 }
0x2b5b   :  { %3796 = vtanh.f32 %v2229_v62 }
0x2b65   :  { %v3797_v63 = vpop.eup %3796 }
0x2b66   :  { %2232 = vrot.lane.b32.xlu0 %v3797_v63, %s3839_s5 }
0x2bd8   :  { %v2233_v0 = vpop.permute.xlu0 %2232 }
0x2bd9   :  { %v2235_v1 = vmul.f32 %v2233_v0, %v2218_v56 }
0x2bdb   :  { %v2236_v2 = vmax.f32 %v2140_v43, %v2235_v1  ;;  %2238 = vrot.lane.b32.xlu1 %v2235_v1, %s3840_s24 }
0x2c4d   :  { %v2239_v5 = vpop.permute.xlu1 %2238 }
0x2c4e   :  { %3461 = vmatmul.mubr.msk.f32.vlgmr.msra.gmra.mrb[28].mxu1 %vm194_vm2, %v2239_v5 }
0x2c4f   :  { %3699 = vmatpush3.bf16.msra.mxu1 %v4333_v11  ;;  %3482 = vmatprep.mubr.msk.f32.mxu1 %vm3837_vm0, %v3838_v4 }
0x2c50   :  { %3700 = vmatprep.subr.bf16.mxu1 %v3836_v3 }
0x2c53   :  { %3702 = vmatpush3.bf16.msra.mxu1 %v4345_v15 }
0x2c54   :  { %3709 = vmatprep.subr.bf16.mxu1 %v3836_v3 }
0x2d21   :  { %v2308_v7 = vpop.f32.mrb[28].mxu1 }
0x2d22   :  { %v2309_v8 = vadd.f32 %v2308_v7, %v1840_v6  ;;  %v3462_v9 = vpop.f32.mrb[29].mxu1 }
0x2d24   :  { %3798 = vtanh.f32 %v2309_v8 }
0x2d2e   :  { %v3799_v10 = vpop.eup %3798 }
0x2d2f   :  { %v2313_v13 = vmul.f32 %v3799_v10, %v4003_v34 }
0x2d31   :  { %v2314_v14 = vadd.f32 %v2313_v13, %v4005_v35 }
0x2d33   :  { %2317 = vrot.lane.b32.xlu0 %v2314_v14, %s3839_s5  ;;  %v2315_v26 = vmul.f32 %v2314_v14, %v2229_v62 }
0x2da5   :  { %v2318_v16 = vpop.permute.xlu0 %2317 }
0x2da6   :  { %v2320_v22 = vmul.f32 %v2318_v16, %v2314_v14 }
0x2da8   :  { %2322 = vrot.lane.b32.xlu1 %v2320_v22, %s3840_s24 }
0x2e1a   :  { %v2323_v27 = vpop.permute.xlu1 %2322 }
0x2e1b   :  { %v2325_v28 = vadd.f32 %v2323_v27, %v2315_v26 }
0x2e1d   :  { %3800 = vtanh.f32 %v2325_v28 }
0x2e27   :  { %v3801_v30 = vpop.eup %3800 }
0x2e28   :  { %2328 = vrot.lane.b32.xlu0 %v3801_v30, %s3839_s5 }
0x2e9a   :  { %v2329_v18 = vpop.permute.xlu0 %2328 }
0x2e9b   :  { %v2331_v37 = vmul.f32 %v2329_v18, %v2314_v14 }
0x2e9d   :  { %v2332_v21 = vmax.f32 %v2236_v2, %v2331_v37  ;;  %2334 = vrot.lane.b32.xlu1 %v2331_v37, %s3840_s24 }
0x2f0f   :  { %v2335_v38 = vpop.permute.xlu1 %2334 }
0x2f10   :  { %3472 = vmatmul.mubr.msk.f32.vlgmr.msra.gmra.mrb[30].mxu0 %vm194_vm2, %v2335_v38 }
0x2f11   :  { %3705 = vmatpush3.bf16.msra.mxu0 %v4333_v11  ;;  %3493 = vmatprep.mubr.msk.f32.mxu0 %vm3837_vm0, %v3838_v4 }
0x2f12   :  { %3706 = vmatprep.subr.bf16.mxu0 %v3836_v3 }
0x2f15   :  { %3708 = vmatpush3.bf16.msra.mxu0 %v4345_v15 }
0x2f16   :  { %3715 = vmatprep.subr.bf16.mxu0 %v3836_v3 }
0x2fe3   :  { %v2404_v12 = vpop.f32.mrb[30].mxu0 }
0x2fe4   :  { %v2405_v40 = vadd.f32 %v2404_v12, %v1845_v39  ;;  %v3473_v36 = vpop.f32.mrb[31].mxu0  ;;  %v2657_v12 = vld [vmem:[%s4667_s14 + $0x28] sm:$0xff] }
0x2fe5   :  { %v2658_v36 = vld [vmem:[%s4667_s14 + $0x30] sm:$0xff] }
0x2fe6   :  { %3802 = vtanh.f32 %v2405_v40 }
0x2ff0   :  { %v3803_v17 = vpop.eup %3802 }
0x2ff1   :  { %v2409_v41 = vmul.f32 %v3803_v17, %v4003_v34 }
0x2ff3   :  { %v2410_v11 = vadd.f32 %v2409_v41, %v4005_v35 }
0x2ff5   :  { %2413 = vrot.lane.b32.xlu0 %v2410_v11, %s3839_s5  ;;  %v2411_v15 = vmul.f32 %v2410_v11, %v2325_v28 }
0x3067   :  { %v2414_v29 = vpop.permute.xlu0 %2413 }
0x3068   :  { %v2416_v43 = vmul.f32 %v2414_v29, %v2410_v11 }
0x306a   :  { %2418 = vrot.lane.b32.xlu1 %v2416_v43, %s3840_s24 }
0x30dc   :  { %v2419_v45 = vpop.permute.xlu1 %2418 }
0x30dd   :  { %v2421_v49 = vadd.f32 %v2419_v45, %v2411_v15  ;;  %v1855_v45 = vadd.f32 %v4444_v46, %v4376_v33  ;;  %v2655_v33 = vld [vmem:[%s4667_s14 + $0x18] sm:$0xff] }
0x30df   :  { %3804 = vtanh.f32 %v2421_v49 }
0x30e9   :  { %v3805_v44 = vpop.eup %3804 }
0x30ea   :  { %2424 = vrot.lane.b32.xlu0 %v3805_v44, %s3839_s5 }
0x315c   :  { %v2425_v50 = vpop.permute.xlu0 %2424 }
0x315d   :  { %v2427_v51 = vmul.f32 %v2425_v50, %v2410_v11 }
0x315f   :  { %v4490_v52 = vmax.f32 %v2332_v21, %v2427_v51  ;;  %2430 = vrot.lane.b32.xlu1 %v2427_v51, %s3840_s24  ;;  %v2652_v51 = vld [vmem:[%s4667_s14] sm:$0xff] }
0x3160   :  { %v3716_v19 = vpack.c.bf16 %v2653_v24, %v2652_v51 }
0x31d1   :  { %v2431_v53 = vpop.permute.xlu1 %2430 }
0x31d2   :  { %3483 = vmatmul.mubr.msk.f32.vlgmr.msra.gmra.mrb[30].mxu1 %vm194_vm2, %v2431_v53 }
0x31d3   :  { %3504 = vmatprep.mubr.msk.f32.mxu1 %vm3837_vm0, %v3838_v4 }
0x32a5   :  { %v2500_v42 = vpop.f32.mrb[30].mxu1 }
0x32a6   :  { %v2501_v56 = vadd.f32 %v2500_v42, %v1850_v54  ;;  %v3484_v57 = vpop.f32.mrb[31].mxu1 }
0x32a7   :  { %v2623_v57 = vld [vmem:[%s4668_s13 + $0x8] sm:$0xff] }
0x32a8   :  { %3806 = vtanh.f32 %v2501_v56  ;;  %v2622_v56 = vld [vmem:[%s4668_s13] sm:$0xff] }
0x32a9   :  { %3808 = vtanh.f32 %v4371_v31 }
0x32b2   :  { %v3807_v58 = vpop.eup %3806 }
0x32b3   :  { %v2505_v59 = vmul.f32 %v3807_v58, %v4003_v34  ;;  %v3809_v2 = vpop.eup %3808  ;;  %v2626_v58 = vld [vmem:[%s4668_s13 + $0x20] sm:$0xff] }
0x32b4   :  { %v1681_v5 = vmul.f32 %v3809_v2, %v4003_v34  ;;  %v2629_v2 = vld [vmem:[%s4668_s13 + $0x38] sm:$0xff] }
0x32b5   :  { %v2506_v61 = vadd.f32 %v2505_v59, %v4005_v35  ;;  %v2624_v59 = vld [vmem:[%s4668_s13 + $0x10] sm:$0xff] }
0x32b6   :  { %v1682_v7 = vadd.f32 %v1681_v5, %v4005_v35  ;;  %v2630_v5 = vld [vmem:[%s4668_s13 + $0x40] sm:$0xff] }
0x32b7   :  { %2509 = vrot.lane.b32.xlu0 %v2506_v61, %s3839_s5  ;;  %v2507_v0 = vmul.f32 %v2506_v61, %v2421_v49 }
0x32b8   :  { %v1683_v26 = vmul.f32 %v1682_v7, %v4292_v55  ;;  %v2656_v55 = vld [vmem:[%s4667_s14 + $0x20] sm:$0xff] }
0x32b9   :  { %v3710_v40 = vpack.c.bf16 %v2657_v12, %v2656_v55 }
0x32bb   :  { %3711 = vmatpush3.bf16.msra.mxu1 %v3710_v40  ;;  %v2660_v40 = vld [vmem:[%s4667_s14 + $0x40] sm:$0xff] }
0x32bc   :  { %3712 = vmatprep.subr.bf16.mxu1 %v3836_v3 }
0x3329   :  { %v2510_v62 = vpop.permute.xlu0 %2509 }
0x332a   :  { %v2512_v63 = vmul.f32 %v2510_v62, %v2506_v61  ;;  %v2628_v62 = vld [vmem:[%s4668_s13 + $0x30] sm:$0xff] }
0x332c   :  { %2514 = vrot.lane.b32.xlu1 %v2512_v63, %s3840_s24  ;;  %v2633_v63 = vsel %vm194_vm2, %v2623_v57, -inf }
0x339e   :  { %v2515_v1 = vpop.permute.xlu1 %2514 }
0x339f   :  { %v4503_v48 = vadd.f32 %v2515_v1, %v2507_v0  ;;  %v2636_v0 = vsel %vm194_vm2, %v2626_v58, -inf }
0x33a1   :  { %3810 = vtanh.f32 %v4503_v48 }
0x33a2   :  { %3812 = vtanh.f32 %v4164_v32 }
0x33ab   :  { %v3811_v6 = vpop.eup %3810 }
0x33ac   :  { %2520 = vrot.lane.b32.xlu0 %v3811_v6, %s3839_s5  ;;  %v3813_v8 = vpop.eup %3812  ;;  %v2631_v6 = vld [vmem:[%s4668_s13 + $0x48] sm:$0xff] }
0x33ad   :  { %v761_v10 = vmul.f32 %v3813_v8, %v4003_v34 }
0x33af   :  { %v4519_v22 = vadd.f32 %v761_v10, %v4005_v35 }
0x33b0   :  { %1685 = vrot.lane.b32.xlu0 %v1682_v7, %s3839_s5 }
0x33b1   :  { %v763_v21 = vmul.f32 %v4519_v22, %v4085_v60  ;;  %v2659_v60 = vld [vmem:[%s4667_s14 + $0x38] sm:$0xff] }
0x33b2   :  { %v3713_v17 = vpack.c.bf16 %v2659_v60, %v2658_v36  ;;  %v2661_v36 = vld [vmem:[%s4667_s14 + $0x48] sm:$0xff] }
0x33b3   :  { %v3722_v60 = vpack.c.bf16 %v2661_v36, %v2660_v40 }
0x33b4   :  { %3714 = vmatpush3.bf16.msra.mxu1 %v3713_v17 }
0x33b5   :  { %3721 = vmatprep.subr.bf16.mxu1 %v3836_v3 }
0x341e   :  { %v2521_v31 = vpop.permute.xlu0 %2520 }
0x341f   :  { %v4511_v9 = vmul.f32 %v2521_v31, %v2506_v61  ;;  %v2625_v61 = vld [vmem:[%s4668_s13 + $0x18] sm:$0xff] }
0x3420   :  { %v2635_v8 = vsel %vm194_vm2, %v2625_v61, -inf }
0x3421   :  { %v2524_v13 = vmax.f32 %v4490_v52, %v4511_v9  ;;  %2526 = vrot.lane.b32.xlu1 %v4511_v9, %s3840_s24 }
0x3422   :  { %v1686_v14 = vpop.permute.xlu0 %1685 }
0x3423   :  { %v1688_v16 = vmul.f32 %v1686_v14, %v1682_v7  ;;  %v2640_v14 = vsel %vm194_vm2, %v2628_v62, -inf }
0x3425   :  { %765 = vrot.lane.b32.xlu1 %v4519_v22, %s3839_s5  ;;  %1690 = vrot.lane.b32.xlu0 %v1688_v16, %s3840_s24  ;;  %v2642_v16 = vsel %vm194_vm2, %v2629_v2, -inf }
0x3493   :  { %v2527_v32 = vpop.permute.xlu1 %2526 }
0x3494   :  { %3494 = vmatmul.mubr.msk.f32.vlgmr.msra.gmra.mrb[32].mxu0 %vm194_vm2, %v2527_v32  ;;  %v2644_v32 = vsel %vm194_vm2, %v2630_v5, -inf  ;;  %v3841_v5 = vmov 0  }
0x3495   :  { %3515 = vmatprep.mubr.msk.f32.mxu0 %vm3837_vm0, %v3838_v4  ;;  %3717 = vmatpush3.bf16.msra.mxu0 %v3716_v19 }
0x3496   :  { %3718 = vmatprep.subr.bf16.mxu0 %v3836_v3  ;;  %3733 = vset.pattern.permute.xlu0 %v3841_v5 }
0x3497   :  { %v766_v27 = vpop.permute.xlu1 %765  ;;  %v1691_v28 = vpop.permute.xlu0 %1690 }
0x3498   :  { %v768_v30 = vmul.f32 %v766_v27, %v4519_v22  ;;  %v1693_v18 = vadd.f32 %v1691_v28, %v1683_v26  ;;  %v2646_v26 = vsel %vm194_vm2, %v2631_v6, -inf  ;;  %v2643_v28 = vmax.f32 %v2635_v8, %v2642_v16 }
0x349a   :  { %3814 = vtanh.f32 %v1693_v18  ;;  %770 = vrot.lane.b32.xlu1 %v768_v30, %s3840_s24 }
0x34a4   :  { %v3815_v37 = vpop.eup %3814 }
0x34a5   :  { %1696 = vrot.lane.b32.xlu0 %v3815_v37, %s3839_s5 }
0x350c   :  { %v771_v38 = vpop.permute.xlu1 %770 }
0x350d   :  { %v773_v39 = vadd.f32 %v771_v38, %v763_v21 }
0x350f   :  { %3816 = vtanh.f32 %v773_v39 }
0x3517   :  { %v1697_v41 = vpop.permute.xlu0 %1696 }
0x3518   :  { %v1699_v11 = vmul.f32 %v1697_v41, %v1682_v7  ;;  %v2634_v7 = vsel %vm194_vm2, %v2624_v59, -inf }
0x3519   :  { %v3817_v29 = vpop.eup %3816  ;;  %v2641_v27 = vmax.f32 %v2634_v7, %v2640_v14 }
0x351a   :  { %v1700_v43 = vmax.f32 %v1604_v20, %v1699_v11  ;;  %776 = vrot.lane.b32.xlu1 %v3817_v29, %s3839_s5  ;;  %v2654_v20 = vld [vmem:[%s4667_s14 + $0x10] sm:$0xff] }
0x351b   :  { %v3719_v46 = vpack.c.bf16 %v2655_v33, %v2654_v20  ;;  %v2649_v39 = vmax.f32 %v2641_v27, %v2643_v28 }
0x351c   :  { %3818 = vtanh.f32 %v1700_v43 }
0x351d   :  { %3720 = vmatpush3.bf16.msra.mxu0 %v3719_v46 }
0x3526   :  { %v3819_v15 = vpop.eup %3818 }
0x3527   :  { %2665 = vrot.lane.b32.xlu0 %v3819_v15, %s3840_s24 }
0x3567   :  { %v2596_v49 = vpop.f32.mrb[32].mxu0 }
0x3568   :  { %v2597_v44 = vadd.f32 %v2596_v49, %v1855_v45  ;;  %v3495_v50 = vpop.f32.mrb[33].mxu0 }
0x356a   :  { %3820 = vtanh.f32 %v2597_v44 }
0x3574   :  { %v3821_v53 = vpop.eup %3820 }
0x3575   :  { %v2601_v54 = vmul.f32 %v3821_v53, %v4003_v34  ;;  %v2627_v34 = vld [vmem:[%s4668_s13 + $0x28] sm:$0xff] }
0x3576   :  { %v2638_v1 = vsel %vm194_vm2, %v2627_v34, -inf }
0x3577   :  { %v4569_v42 = vadd.f32 %v2601_v54, %v4005_v35  ;;  %v2632_v35 = vsel %vm194_vm2, %v2622_v56, -inf  ;;  %v2639_v10 = vmax.f32 %v2633_v63, %v2638_v1 }
0x3578   :  { %v2637_v31 = vmax.f32 %v2632_v35, %v2636_v0 }
0x3579   :  { %2605 = vrot.lane.b32.xlu0 %v4569_v42, %s3839_s5  ;;  %v2647_v18 = vmax.f32 %v2639_v10, %v2646_v26  ;;  %v2603_v15 = vmul.f32 %v4569_v42, %v4503_v48 }
0x357a   :  { %v2645_v30 = vmax.f32 %v2637_v31, %v2644_v32 }
0x357c   :  { %v2648_v38 = vmax.f32 %v2645_v30, %v2647_v18 }
0x357e   :  { %v2650_v12 = vmax.f32 %v2648_v38, %v2649_v39 }
0x358c   :  { %v777_v37 = vpop.permute.xlu1 %776 }
0x358d   :  { %v779_v21 = vmul.f32 %v777_v37, %v4519_v22  ;;  %v2662_v22 = vld [vmem:[%s4667_s14 + $0x50] sm:$0xff] }
0x358e   :  { %v3725_v17 = vpack.c.bf16 %v2663_v47, %v2662_v22 }
0x358f   :  { %v780_v55 = vmax.f32 %v684_v25, %v779_v21 }
0x3591   :  { %3822 = vtanh.f32 %v780_v55 }
0x3592   :  { %3824 = vtanh.f32 %v2650_v12 }
0x3599   :  { %v2666_v23 = vpop.permute.xlu0 %2665 }
0x359a   :  { %3505 = vmatmul.mubr.msk.f32.vlgmr.msra.gmra.mrb[32].mxu1 %vm194_vm2, %v2666_v23 }
0x359b   :  { %v3823_v25 = vpop.eup %3822  ;;  %3723 = vmatpush3.bf16.msra.mxu1 %v3722_v60  ;;  %3526 = vmatprep.mubr.msk.f32.mxu1 %vm3837_vm0, %v3838_v4 }
0x359c   :  { %2740 = vrot.lane.b32.xlu1 %v3823_v25, %s3840_s24  ;;  %3724 = vmatprep.subr.bf16.mxu1 %v3836_v3  ;;  %v3825_v41 = vpop.eup %3824 }
0x359f   :  { %3726 = vmatpush3.bf16.msra.mxu1 %v3725_v17 }
0x35a2   :  { %3527 = vmatmul.mubr.msk.f32.vlgmr.msra.gmra.mrb[34].mxu1 %vm194_vm2, %v3825_v41 }
0x35eb   :  { %v2606_v11 = vpop.permute.xlu0 %2605 }
0x35ec   :  { %v2608_v29 = vmul.f32 %v2606_v11, %v4569_v42 }
0x35ee   :  { %2610 = vrot.lane.b32.xlu1 %v2608_v29, %s3840_s24 }
0x360e   :  { %v2741_v43 = vpop.permute.xlu1 %2740 }
0x360f   :  { %3516 = vmatmul.mubr.msk.f32.vlgmr.msra.gmra.mrb[34].mxu0 %vm194_vm2, %v2741_v43 }
0x3660   :  { %v2611_v4 = vpop.permute.xlu1 %2610 }
0x3661   :  { %v2613_v45 = vadd.f32 %v2611_v4, %v2603_v15 }
0x3663   :  { %3826 = vtanh.f32 %v2613_v45 }
0x366d   :  { %v3827_v49 = vpop.eup %3826  ;;  %v2735_v3 = vpop.f32.mrb[32].mxu1 }
0x366e   :  { %v3506_v44 = vpop.f32.mrb[33].mxu1  ;;  %2616 = vrot.lane.b32.xlu0 %v3827_v49, %s3839_s5 }
0x3675   :  { %v2883_v50 = vpop.f32.mrb[34].mxu1 }
0x3676   :  { %v3528_v51 = vpop.f32.mrb[35].mxu1 }
0x36e0   :  { %v2617_v24 = vpop.permute.xlu0 %2616 }
0x36e1   :  { %v2619_v19 = vmul.f32 %v2617_v24, %v4569_v42  ;;  %v3001_v42 = vld [vmem:[%s4669_s15] ss:$0 sm:$0xff] }
0x36e2   :  { %v2810_v20 = vpop.f32.mrb[34].mxu0 }
0x36e3   :  { %v2620_v33 = vmax.f32 %v2524_v13, %v2619_v19  ;;  %v2811_v46 = vadd.f32 %v2810_v20, %v2735_v3  ;;  %v3517_v48 = vpop.f32.mrb[35].mxu0 }
0x36e5   :  { %3828 = vtanh.f32 %v2620_v33  ;;  %v2887_v53 = vadd.f32 %v2883_v50, %v2811_v46 }
0x36e7   :  { %v2895_v58 = vadd.f32 %v3001_v42, %v2887_v53 }
0x36e9   :  { %3830 = vtanh.f32 %v2895_v58 }
0x36ef   :  { %v3829_v54 = vpop.eup %3828 }
0x36f0   :  { %2915 = vrot.lane.b32.xlu0 %v3829_v54, %s3840_s24  ;;  %v2902_v56 = vmul.f32 %v3829_v54, %v3829_v54  ;;  %v2926_v57 = vrot.slane %v3829_v54, 2 }
0x36f2   :  { %2904 = vrot.lane.b32.xlu1 %v2902_v56, %s3840_s24 }
0x36f3   :  { %v3831_v52 = vpop.eup %3830 }
0x36f4   :  { %v2897_v9 = vmul.f32 %v3831_v52, %v3831_v52 }
0x36f6   :  { %2927 = vrot.lane.b32.xlu1 %v2926_v57, %s3840_s24  ;;  %v2899_v13 = vsel %vm2898_vm3, %v2897_v9, 0.0 }
0x370f   :  { %2900 = vadd.xlane.f32.xlu0 %v2899_v13 }
0x3762   :  { %v2916_v34 = vpop.permute.xlu0 %2915 }
0x3763   :  { %v2918_v59 = vmul.f32 %v3831_v52, %v2916_v34 }
0x3764   :  { %v2905_v35 = vpop.permute.xlu1 %2904 }
0x3765   :  { %v2911_v61 = vsel %vm2910_vm4, %v2905_v35, 0.0  ;;  %v2907_v62 = vsel %vm2898_vm3, %v2905_v35, 0.0  ;;  %v2919_v1 = vsel %vm2898_vm3, %v2918_v59, 0.0 }
0x3766   :  { %2912 = vadd.xlane.f32.xlu0 %v2911_v61  ;;  %2908 = vadd.xlane.f32.xlu1 %v2907_v62 }
0x3768   :  { %v2928_v63 = vpop.permute.xlu1 %2927 }
0x3769   :  { %v2930_v0 = vmul.f32 %v3831_v52, %v2928_v63 }
0x376a   :  { %2920 = vadd.xlane.f32.xlu0 %v2919_v1 }
0x376b   :  { %v2931_v2 = vsel %vm2898_vm3, %v2930_v0, 0.0 }
0x376c   :  { %2932 = vadd.xlane.f32.xlu1 %v2931_v2 }
0x379c   :  { %v2901_v6 = vpop.xlane.xlu0 %2900 }
0x37f3   :  { %v2913_v7 = vpop.xlane.xlu0 %2912  ;;  %v2909_v8 = vpop.xlane.xlu1 %2908 }
0x37f4   :  { %v2935_v31 = vrot.slane %v2913_v7, 2  ;;  %v2922_v10 = vmul.f32 %v2909_v8, %v2901_v6 }
0x37f6   :  { %v2937_v14 = vmul.f32 %v2935_v31, %v2901_v6  ;;  %v2923_v16 = vmax.f32 %v2922_v10, 1e-16 }
0x37f7   :  { %v2921_v27 = vpop.xlane.xlu0 %2920 }
0x37f8   :  { %v2938_v32 = vmax.f32 %v2937_v14, 1e-16  ;;  %3832 = vrsqrt.f32 %v2923_v16 }
0x37f9   :  { %v2933_v18 = vpop.xlane.xlu1 %2932 }
0x37fa   :  { %3834 = vrsqrt.f32 %v2938_v32 }
0x3802   :  { %v3833_v26 = vpop.eup %3832 }
0x3803   :  { %v2925_v28 = vmul.f32 %v3833_v26, %v2921_v27 }
0x3804   :  { %v3835_v30 = vpop.eup %3834 }
0x3805   :  { %v2941_v37 = vsub.f32 0.05, %v2925_v28  ;;  %v2940_v21 = vmul.f32 %v3835_v30, %v2933_v18 }
0x3807   :  { %v2942_v38 = vadd.f32 %v2941_v37, %v2940_v21 }
0x3809   :  { %v2943_v39 = vmax.f32 %v2942_v38, 1e-06 }
0x380b   :  { %2946 = vperm.xlu0 %3733, %v2943_v39  }
0x388a   :  { %v2947_v55 = vpop.permute.xlu0 %2946 }
0x388b   :  { %2949 = vst [vmem:[%s4670_s16] sm:$0x3] %v2947_v55 }

</bundles_post_ra>
